<compile_context>
chip_gen: v7x
topology: tpu7x:2x2x1
jax: 0.10.0
libtpu: 0.0.40
codegen_flags: <defaults>
</compile_context>

<pallas_src>
import functools

import jax
import jax.numpy as jnp
from jax.experimental import pallas as pl
from jax.experimental.pallas import tpu as pltpu


# ------------------------------ in-kernel math ------------------------------
def _layernorm(x, gamma, beta, eps=1e-5):
    mu = jnp.mean(x, axis=-1, keepdims=True)
    var = jnp.mean(jnp.square(x - mu), axis=-1, keepdims=True)
    return (x - mu) * jax.lax.rsqrt(var + eps) * gamma + beta


def _mha_core(q, k, v, wo_ref, bo, nhead, hd):
    """Multi-head attention core for one batch element.

    q: (lq, E) f32 (scale already folded into the Q projection), k/v: (lk, E) f32,
    wo_ref: (h, hd, E) bf16 Ref, bo: (1, E) f32.

    Per head: 2D bf16 MXU matmuls with f32 accumulation, exact f32 softmax, and the
    head merge folded into an accumulated output projection — no concats, no full-tensor
    VMEM copies of Q/K/V/ctx.
    """
    bf16 = jnp.bfloat16
    f32 = jnp.float32
    qb = q.astype(bf16)
    kb = k.astype(bf16)
    vb = v.astype(bf16)
    out = None
    for h in range(nhead):
        sl = slice(h * hd, (h + 1) * hd)
        s = jax.lax.dot_general(qb[:, sl], kb[:, sl], (((1,), (1,)), ((), ())),
                                preferred_element_type=f32)          # (lq, lk)
        s = s - jnp.max(s, axis=-1, keepdims=True)
        p = jnp.exp(s)
        p = p / jnp.sum(p, axis=-1, keepdims=True)                   # exact softmax
        ctx = jnp.dot(p.astype(bf16), vb[:, sl],
                      preferred_element_type=f32)                    # (lq, hd)
        contrib = jnp.dot(ctx.astype(bf16), wo_ref[h],
                          preferred_element_type=f32)                # (lq, E)
        out = contrib if out is None else out + contrib
    return out + bo


# ---------------------------------- kernel ----------------------------------
def _cross_attn_layer_kernel(*refs, nhead, k_is_q, v_src, cv_is_ck, has_pos0):
    n_act = (2 + (0 if k_is_q else 1) + (1 if v_src == 'x' else 0)
             + (0 if cv_is_ck else 1) + (1 if has_pos0 else 0))
    act_refs = refs[:n_act]
    (wq_s_ref, wk_s_ref, wv_s_ref, wo_s_ref,
     wq_c_ref, wk_c_ref, wv_c_ref, wo_c_ref,
     w1_ref, w2_ref, b_e_ref, b1_ref, norms_ref) = refs[n_act:n_act + 13]
    out_ref = refs[n_act + 13]

    it = iter(act_refs)
    xq_ref = next(it)
    xk_ref = xq_ref if k_is_q else next(it)
    if v_src == 'q':
        xv_ref = xq_ref
    elif v_src == 'k':
        xv_ref = xk_ref
    else:
        xv_ref = next(it)
    xck_ref = next(it)
    xcv_ref = xck_ref if cv_is_ck else next(it)
    pos_ref = next(it) if has_pos0 else None

    e = wq_s_ref.shape[0]
    hd = e // nhead
    f32 = jnp.float32
    bf16 = jnp.bfloat16

    b_e = b_e_ref[...]      # (9,E): [sq_b*scale, sk_b, sv_b, so_b, cq_b*scale, ck_b, cv_b, co_b, ffn2_b]
    norms = norms_ref[...]  # (6,E): [n1g, n1b, n2g, n2b, n3g, n3b]

    # ---- self attention (1/sqrt(hd) pre-folded into Wq / bq) ----
    xq = xq_ref[...]                        # f32; residual is q (query + pos), per forward_post
    xq_b = xq.astype(bf16)
    xk_b = xq_b if k_is_q else xk_ref[...].astype(bf16)
    if v_src == 'q':
        xv_b = xq_b
    elif v_src == 'k':
        xv_b = xk_b
    else:
        xv_b = xv_ref[...].astype(bf16)
    q2 = jnp.dot(xq_b, wq_s_ref[...], preferred_element_type=f32) + b_e[0:1]
    k2 = jnp.dot(xk_b, wk_s_ref[...], preferred_element_type=f32) + b_e[1:2]
    v2 = jnp.dot(xv_b, wv_s_ref[...], preferred_element_type=f32) + b_e[2:3]
    tgt2 = _mha_core(q2, k2, v2, wo_s_ref, b_e[3:4], nhead, hd)
    tgt = _layernorm(xq + tgt2, norms[0:1], norms[1:2])

    # ---- cross attention ----
    qc_in = (tgt + pos_ref[...]) if has_pos0 else tgt
    xck_b = xck_ref[...].astype(bf16)
    xcv_b = xck_b if cv_is_ck else xcv_ref[...].astype(bf16)
    qc = jnp.dot(qc_in.astype(bf16), wq_c_ref[...], preferred_element_type=f32) + b_e[4:5]
    kc = jnp.dot(xck_b, wk_c_ref[...], preferred_element_type=f32) + b_e[5:6]
    vc = jnp.dot(xcv_b, wv_c_ref[...], preferred_element_type=f32) + b_e[6:7]
    tgt2 = _mha_core(qc, kc, vc, wo_c_ref, b_e[7:8], nhead, hd)
    tgt = _layernorm(tgt + tgt2, norms[2:3], norms[3:4])

    # ---- feed-forward (ReLU); dropouts are identity in eval ----
    hid = jnp.maximum(
        jnp.dot(tgt.astype(bf16), w1_ref[...], preferred_element_type=f32) + b1_ref[...], 0.0)
    ff = jnp.dot(hid.astype(bf16), w2_ref[...], preferred_element_type=f32) + b_e[8:9]
    out_ref[...] = _layernorm(tgt + ff, norms[4:5], norms[5:6])


# --------------------------------- wrapper -----------------------------------
def pack_params(raw, nhead):
    """Fold / repack the 26 PyTorch-style f32 tensors into 13 TPU-friendly arrays.

    Matmul weights go to bf16 (MXU operands); biases / layernorm params stay f32.
    The 1/sqrt(head_dim) scale is folded into Wq/bq of both attentions; the output
    projections are pre-reshaped to (h, hd, E) so the head merge folds into them.
    """
    (swq, sbq, swk, sbk, swv, sbv, swo, sbo,
     cwq, cbq, cwk, cbk, cwv, cbv, cwo, cbo,
     w1, b1, w2, b2, n1g, n1b, n2g, n2b, n3g, n3b) = raw
    e = swq.shape[0]
    hd = e // nhead
    scale = 1.0 / float(hd) ** 0.5
    bf16 = jnp.bfloat16
    f32 = jnp.float32
    wo_s = swo.reshape(nhead, hd, e).astype(bf16)
    wo_c = cwo.reshape(nhead, hd, e).astype(bf16)
    b_e = jnp.concatenate([sbq * scale, sbk, sbv, sbo,
                           cbq * scale, cbk, cbv, cbo, b2], axis=0).astype(f32)   # (9,E)
    norms = jnp.concatenate([n1g, n1b, n2g, n2b, n3g, n3b], axis=0).astype(f32)   # (6,E)
    return ((swq * scale).astype(bf16), swk.astype(bf16), swv.astype(bf16), wo_s,
            (cwq * scale).astype(bf16), cwk.astype(bf16), cwv.astype(bf16), wo_c,
            w1.astype(bf16), w2.astype(bf16), b_e, b1.astype(f32), norms)


def cross_attn_layer(query, key, value, cross_kv, pos_list, packed_params, *, nhead):
    """CrossAttnLayer.forward_post (eval mode) as one fused Pallas call, gridded over batch.

    query/key/value: (L, N, E) seq-first; cross_kv = [cross_k, cross_v], each (Lc, N, E);
    pos_list = [pos_q, pos_k, pos_v] (entries may be None; structure is static at trace time).
    """
    l, n, e = query.shape
    cross_k, cross_v = cross_kv
    pos0, pos1, pos2 = pos_list

    def prep(t, p):          # with_pos_embed + (S, N, E) -> batch-major (N, S, E), once, in XLA
        t = t if p is None else t + p
        return jnp.transpose(t, (1, 0, 2))

    # Static structural de-duplication of inputs (conservative, by object identity).
    k_is_q = (key is query) and (pos1 is pos0)
    if (value is query) and (pos2 is pos0):
        v_src = 'q'
    elif (value is key) and (pos2 is pos1):
        v_src = 'k'
    else:
        v_src = 'x'
    cv_is_ck = (cross_v is cross_k) and (pos2 is pos1)
    has_pos0 = pos0 is not None

    acts = [prep(query, pos0)]
    if not k_is_q:
        acts.append(prep(key, pos1))
    if v_src == 'x':
        acts.append(prep(value, pos2))
    acts.append(prep(cross_k, pos1))
    if not cv_is_ck:
        acts.append(prep(cross_v, pos2))
    if has_pos0:
        acts.append(jnp.transpose(pos0, (1, 0, 2)))   # needed only for the cross-attn query
    params = list(packed_params)

    def act_spec(a):         # one batch element per grid step (leading dim squeezed)
        return pl.BlockSpec((None,) + a.shape[1:], lambda b: (b, 0, 0))

    def const_spec(p):       # full array, constant index map -> DMA'd once, VMEM-resident
        nd = p.ndim
        return pl.BlockSpec(p.shape, lambda b: (0,) * nd)

    in_specs = [act_spec(a) for a in acts] + [const_spec(p) for p in params]

    kernel = functools.partial(
        _cross_attn_layer_kernel, nhead=nhead, k_is_q=k_is_q, v_src=v_src,
        cv_is_ck=cv_is_ck, has_pos0=has_pos0)

    out = pl.pallas_call(
        kernel,
        out_shape=jax.ShapeDtypeStruct((n, l, e), jnp.float32),
        grid=(n,),
        in_specs=in_specs,
        out_specs=pl.BlockSpec((None, l, e), lambda b: (b, 0, 0)),
        compiler_params=pltpu.CompilerParams(dimension_semantics=("parallel",)),
    )(*acts, *params)
    return jnp.transpose(out, (1, 0, 2))               # back to (L, N, E)


# ---------------------------- pure-JAX reference -----------------------------
def _ref_mha(q, k, v, wq, bq, wk, bk, wv, bv, wo, bo, nhead):
    lq, n, e = q.shape
    lk = k.shape[0]
    hd = e // nhead
    scale = 1.0 / float(hd) ** 0.5
    qp = (jnp.einsum('lne,ef->lnf', q, wq) + bq) * scale
    kp = jnp.einsum('lne,ef->lnf', k, wk) + bk
    vp = jnp.einsum('lne,ef->lnf', v, wv) + bv
    qh = qp.reshape(lq, n, nhead, hd)
    kh = kp.reshape(lk, n, nhead, hd)
    vh = vp.reshape(lk, n, nhead, hd)
    s = jnp.einsum('qnhd,knhd->nhqk', qh, kh)
    p = jax.nn.softmax(s, axis=-1)
    ctx = jnp.einsum('nhqk,knhd->qnhd', p, vh).reshape(lq, n, e)
    return jnp.einsum('lne,ef->lnf', ctx, wo) + bo


def reference(query, key, value, cross_kv, pos_list, raw_params, *, nhead):
    """Direct f32 transcription of CrossAttnLayer.forward_post (uses the raw params)."""
    (swq, sbq, swk, sbk, swv, sbv, swo, sbo,
     cwq, cbq, cwk, cbk, cwv, cbv, cwo, cbo,
     w1, b1, w2, b2, n1g, n1b, n2g, n2b, n3g, n3b) = raw_params
    pe = lambda t, p: t if p is None else t + p
    q = pe(query, pos_list[0])
    k = pe(key, pos_list[1])
    v = pe(value, pos_list[2])
    tgt2 = _ref_mha(q, k, v, swq, sbq, swk, sbk, swv, sbv, swo, sbo, nhead)
    tgt = _layernorm(q + tgt2, n1g, n1b)            # residual on q (with pos), as in PyTorch
    ck, cv = cross_kv
    q2 = pe(tgt, pos_list[0])
    k2 = pe(ck, pos_list[1])
    v2 = pe(cv, pos_list[2])
    tgt2 = _ref_mha(q2, k2, v2, cwq, cbq, cwk, cbk, cwv, cbv, cwo, cbo, nhead)
    tgt = _layernorm(tgt + tgt2, n2g, n2b)
    hid = jnp.maximum(jnp.einsum('lne,ef->lnf', tgt, w1) + b1, 0.0)
    ff = jnp.einsum('lnf,fe->lne', hid, w2) + b2
    return _layernorm(tgt + ff, n3g, n3b)


# ---------------------------- deterministic params ---------------------------
def init_params(key, d_model, dim_ff):
    keys = jax.random.split(key, 26)
    it = iter(keys)

    def nrm(shape, scale=0.1):
        return (scale * jax.random.normal(next(it), shape)).astype(jnp.float32)

    p = []
    for _ in range(2):                       # self_attn, cross_attn
        for _ in range(4):                   # Wq, Wk, Wv, Wout (stored as (in, out))
            p.append(nrm((d_model, d_model)))
            p.append(nrm((1, d_model), 0.02))
    p.append(nrm((d_model, dim_ff)))         # linear1 weight (in, out)
    p.append(nrm((1, dim_ff), 0.02))         # linear1 bias
    p.append(nrm((dim_ff, d_model)))         # linear2 weight (in, out)
    p.append(nrm((1, d_model), 0.02))        # linear2 bias
    for _ in range(3):                       # norm1..3 gamma / beta
        p.append(1.0 + nrm((1, d_model), 0.05))
        p.append(nrm((1, d_model), 0.02))
    return tuple(p)


if __name__ == "__main__":
    d_model, nhead, dim_ff = 32, 4, 64
    L, Lc, N = 8, 16, 2
    root = jax.random.PRNGKey(0)
    k_q, k_fa, k_fb, k_pos, k_par = jax.random.split(root, 5)
    query_embed = jax.random.normal(k_q, (L, N, d_model), jnp.float32)
    imgf_a = jax.random.normal(k_fa, (Lc, N, d_model), jnp.float32)   # Lc != L, no-pos mode
    imgf_b = jax.random.normal(k_fb, (L, N, d_model), jnp.float32)    # matches pos length
    pos = jax.random.normal(k_pos, (L, N, d_model), jnp.float32)
    raw = init_params(k_par, d_model, dim_ff)
    packed = pack_params(raw, nhead)

    q_pre = query_embed + pos   # pos_encoding_before=True: pos folded in before layer 0
    configs = [
        # TransDecoder default: pos_encoding_before=True -> pos_list = [None]*3
        (q_pre, q_pre, q_pre, [imgf_a, imgf_a], [None, None, None]),
        # pos_encoding_before=False, pos_encoding_value=True  -> pos_list = [pos]*3
        (query_embed, query_embed, query_embed, [imgf_b, imgf_b], [pos, pos, pos]),
        # pos_encoding_before=False, pos_encoding_value=False -> pos_list = [pos, pos, None]
        (query_embed, query_embed, query_embed, [imgf_b, imgf_b], [pos, pos, None]),
    ]
    for q, k, v, ckv, pos_list in configs:
        out = jax.block_until_ready(
            cross_attn_layer(q, k, v, ckv, pos_list, packed, nhead=nhead))
        ref = reference(q, k, v, ckv, pos_list, raw, nhead=nhead)
        assert out.shape == (L, N, d_model)
        assert bool(jnp.all(jnp.isfinite(out)))
        # bf16 MXU operands (weights + activations) with f32 accumulation vs. the all-f32
        # reference: expected error ~1e-2 absolute after two attentions + FFN + 3 layernorms.
        err = jnp.abs(out - ref)
        assert float(jnp.max(err)) < 1e-1, float(jnp.max(err))
        assert float(jnp.mean(err)) < 2e-2, float(jnp.mean(err))
    print("KERNEL_OK")
</pallas_src>

<mosaic_0001>
module attributes {stable_mosaic.version = 11 : i64} {
  func.func @_cross_attn_layer_kernel(%arg0: i32, %arg1: memref<1x8x32xf32, #tpu.memory_space<vmem>>, %arg2: memref<1x16x32xf32, #tpu.memory_space<vmem>>, %arg3: memref<32x32xbf16, #tpu.memory_space<vmem>>, %arg4: memref<32x32xbf16, #tpu.memory_space<vmem>>, %arg5: memref<32x32xbf16, #tpu.memory_space<vmem>>, %arg6: memref<4x8x32xbf16, #tpu.memory_space<vmem>>, %arg7: memref<32x32xbf16, #tpu.memory_space<vmem>>, %arg8: memref<32x32xbf16, #tpu.memory_space<vmem>>, %arg9: memref<32x32xbf16, #tpu.memory_space<vmem>>, %arg10: memref<4x8x32xbf16, #tpu.memory_space<vmem>>, %arg11: memref<32x64xbf16, #tpu.memory_space<vmem>>, %arg12: memref<64x32xbf16, #tpu.memory_space<vmem>>, %arg13: memref<9x32xf32, #tpu.memory_space<vmem>>, %arg14: memref<1x64xf32, #tpu.memory_space<vmem>>, %arg15: memref<6x32xf32, #tpu.memory_space<vmem>>, %arg16: memref<1x8x32xf32, #tpu.memory_space<vmem>>) attributes {dimension_semantics = [#tpu.dimension_semantics<parallel>], iteration_bounds = array<i64: 2>, scalar_prefetch = 0 : i64, scratch_operands = 0 : i64, tpu.core_type = #tpu.core_type<tc>, window_params = [{transform_indices = @transform_0, window_bounds = array<i64: 1, 8, 32>}, {transform_indices = @transform_1, window_bounds = array<i64: 1, 16, 32>}, {pipeline_mode = #tpu.pipeline_mode<synchronous>, transform_indices = @transform_2, window_bounds = array<i64: 32, 32>}, {pipeline_mode = #tpu.pipeline_mode<synchronous>, transform_indices = @transform_3, window_bounds = array<i64: 32, 32>}, {pipeline_mode = #tpu.pipeline_mode<synchronous>, transform_indices = @transform_4, window_bounds = array<i64: 32, 32>}, {pipeline_mode = #tpu.pipeline_mode<synchronous>, transform_indices = @transform_5, window_bounds = array<i64: 4, 8, 32>}, {pipeline_mode = #tpu.pipeline_mode<synchronous>, transform_indices = @transform_6, window_bounds = array<i64: 32, 32>}, {pipeline_mode = #tpu.pipeline_mode<synchronous>, transform_indices = @transform_7, window_bounds = array<i64: 32, 32>}, {pipeline_mode = #tpu.pipeline_mode<synchronous>, transform_indices = @transform_8, window_bounds = array<i64: 32, 32>}, {pipeline_mode = #tpu.pipeline_mode<synchronous>, transform_indices = @transform_9, window_bounds = array<i64: 4, 8, 32>}, {pipeline_mode = #tpu.pipeline_mode<synchronous>, transform_indices = @transform_10, window_bounds = array<i64: 32, 64>}, {pipeline_mode = #tpu.pipeline_mode<synchronous>, transform_indices = @transform_11, window_bounds = array<i64: 64, 32>}, {pipeline_mode = #tpu.pipeline_mode<synchronous>, transform_indices = @transform_12, window_bounds = array<i64: 9, 32>}, {pipeline_mode = #tpu.pipeline_mode<synchronous>, transform_indices = @transform_13, window_bounds = array<i64: 1, 64>}, {pipeline_mode = #tpu.pipeline_mode<synchronous>, transform_indices = @transform_14, window_bounds = array<i64: 6, 32>}, {transform_indices = @transform_15, window_bounds = array<i64: 1, 8, 32>}]} {
    %c0 = arith.constant 0 : index
    %c0_0 = arith.constant 0 : index
    %0 = vector.load %arg13[%c0, %c0_0] : memref<9x32xf32, #tpu.memory_space<vmem>>, vector<9x32xf32>
    %c0_1 = arith.constant 0 : index
    %c0_2 = arith.constant 0 : index
    %1 = vector.load %arg15[%c0_1, %c0_2] : memref<6x32xf32, #tpu.memory_space<vmem>>, vector<6x32xf32>
    %c0_3 = arith.constant 0 : index
    %c0_4 = arith.constant 0 : index
    %c0_5 = arith.constant 0 : index
    %2 = vector.load %arg1[%c0_3, %c0_4, %c0_5] : memref<1x8x32xf32, #tpu.memory_space<vmem>>, vector<1x8x32xf32>
    %3 = vector.shape_cast %2 : vector<1x8x32xf32> to vector<8x32xf32>
    %4 = arith.truncf %3 : vector<8x32xf32> to vector<8x32xbf16>
    %c0_6 = arith.constant 0 : index
    %c0_7 = arith.constant 0 : index
    %5 = vector.load %arg3[%c0_6, %c0_7] : memref<32x32xbf16, #tpu.memory_space<vmem>>, vector<32x32xbf16>
    %cst = arith.constant dense<0.000000e+00> : vector<8x32xf32>
    %6 = tpu.matmul %4, %5, %cst {dimension_numbers = #tpu.dot_dimension_numbers<[1], [0], [0], [1], [0, 0, 1, 1], [], []>} : vector<8x32xbf16>, vector<32x32xbf16>, vector<8x32xf32> -> vector<8x32xf32>
    %7 = vector.extract_strided_slice %0 {offsets = [0, 0], sizes = [1, 32], strides = [1, 1]} : vector<9x32xf32> to vector<1x32xf32>
    %8 = vector.broadcast %7 : vector<1x32xf32> to vector<8x32xf32>
    %9 = arith.addf %6, %8 : vector<8x32xf32>
    %c0_8 = arith.constant 0 : index
    %c0_9 = arith.constant 0 : index
    %10 = vector.load %arg4[%c0_8, %c0_9] : memref<32x32xbf16, #tpu.memory_space<vmem>>, vector<32x32xbf16>
    %cst_10 = arith.constant dense<0.000000e+00> : vector<8x32xf32>
    %11 = tpu.matmul %4, %10, %cst_10 {dimension_numbers = #tpu.dot_dimension_numbers<[1], [0], [0], [1], [0, 0, 1, 1], [], []>} : vector<8x32xbf16>, vector<32x32xbf16>, vector<8x32xf32> -> vector<8x32xf32>
    %12 = vector.extract_strided_slice %0 {offsets = [1, 0], sizes = [1, 32], strides = [1, 1]} : vector<9x32xf32> to vector<1x32xf32>
    %13 = vector.broadcast %12 : vector<1x32xf32> to vector<8x32xf32>
    %14 = arith.addf %11, %13 : vector<8x32xf32>
    %c0_11 = arith.constant 0 : index
    %c0_12 = arith.constant 0 : index
    %15 = vector.load %arg5[%c0_11, %c0_12] : memref<32x32xbf16, #tpu.memory_space<vmem>>, vector<32x32xbf16>
    %cst_13 = arith.constant dense<0.000000e+00> : vector<8x32xf32>
    %16 = tpu.matmul %4, %15, %cst_13 {dimension_numbers = #tpu.dot_dimension_numbers<[1], [0], [0], [1], [0, 0, 1, 1], [], []>} : vector<8x32xbf16>, vector<32x32xbf16>, vector<8x32xf32> -> vector<8x32xf32>
    %17 = vector.extract_strided_slice %0 {offsets = [2, 0], sizes = [1, 32], strides = [1, 1]} : vector<9x32xf32> to vector<1x32xf32>
    %18 = vector.broadcast %17 : vector<1x32xf32> to vector<8x32xf32>
    %19 = arith.addf %16, %18 : vector<8x32xf32>
    %20 = vector.extract_strided_slice %0 {offsets = [3, 0], sizes = [1, 32], strides = [1, 1]} : vector<9x32xf32> to vector<1x32xf32>
    %21 = arith.truncf %9 : vector<8x32xf32> to vector<8x32xbf16>
    %22 = arith.truncf %14 : vector<8x32xf32> to vector<8x32xbf16>
    %23 = arith.truncf %19 : vector<8x32xf32> to vector<8x32xbf16>
    %24 = vector.extract_strided_slice %21 {offsets = [0, 0], sizes = [8, 8], strides = [1, 1]} : vector<8x32xbf16> to vector<8x8xbf16>
    %25 = vector.extract_strided_slice %22 {offsets = [0, 0], sizes = [8, 8], strides = [1, 1]} : vector<8x32xbf16> to vector<8x8xbf16>
    %cst_14 = arith.constant dense<0.000000e+00> : vector<8x8xf32>
    %26 = tpu.matmul %24, %25, %cst_14 {dimension_numbers = #tpu.dot_dimension_numbers<[1], [1], [0], [0], [0, 0, 1, 0], [], []>} : vector<8x8xbf16>, vector<8x8xbf16>, vector<8x8xf32> -> vector<8x8xf32>
    %cst_15 = arith.constant dense<0xFF800000> : vector<8xf32>
    %27 = vector.multi_reduction <maximumf>, %26, %cst_15 [1] : vector<8x8xf32> to vector<8xf32>
    %28 = vector.shape_cast %27 : vector<8xf32> to vector<8x1xf32>
    %29 = vector.broadcast %28 : vector<8x1xf32> to vector<8x8xf32>
    %30 = arith.subf %26, %29 : vector<8x8xf32>
    %31 = math.exp %30 : vector<8x8xf32>
    %cst_16 = arith.constant dense<0.000000e+00> : vector<8xf32>
    %32 = vector.multi_reduction <add>, %31, %cst_16 [1] : vector<8x8xf32> to vector<8xf32>
    %33 = vector.shape_cast %32 : vector<8xf32> to vector<8x1xf32>
    %34 = vector.broadcast %33 : vector<8x1xf32> to vector<8x8xf32>
    %35 = arith.divf %31, %34 : vector<8x8xf32>
    %36 = arith.truncf %35 : vector<8x8xf32> to vector<8x8xbf16>
    %37 = vector.extract_strided_slice %23 {offsets = [0, 0], sizes = [8, 8], strides = [1, 1]} : vector<8x32xbf16> to vector<8x8xbf16>
    %cst_17 = arith.constant dense<0.000000e+00> : vector<8x8xf32>
    %38 = tpu.matmul %36, %37, %cst_17 {dimension_numbers = #tpu.dot_dimension_numbers<[1], [0], [0], [1], [0, 0, 1, 1], [], []>} : vector<8x8xbf16>, vector<8x8xbf16>, vector<8x8xf32> -> vector<8x8xf32>
    %39 = arith.truncf %38 : vector<8x8xf32> to vector<8x8xbf16>
    %c0_18 = arith.constant 0 : index
    %c0_19 = arith.constant 0 : index
    %c0_20 = arith.constant 0 : index
    %40 = vector.load %arg6[%c0_18, %c0_19, %c0_20] : memref<4x8x32xbf16, #tpu.memory_space<vmem>>, vector<1x8x32xbf16>
    %41 = vector.shape_cast %40 : vector<1x8x32xbf16> to vector<8x32xbf16>
    %cst_21 = arith.constant dense<0.000000e+00> : vector<8x32xf32>
    %42 = tpu.matmul %39, %41, %cst_21 {dimension_numbers = #tpu.dot_dimension_numbers<[1], [0], [0], [1], [0, 0, 1, 1], [], []>} : vector<8x8xbf16>, vector<8x32xbf16>, vector<8x32xf32> -> vector<8x32xf32>
    %43 = vector.extract_strided_slice %21 {offsets = [0, 8], sizes = [8, 8], strides = [1, 1]} : vector<8x32xbf16> to vector<8x8xbf16>
    %44 = vector.extract_strided_slice %22 {offsets = [0, 8], sizes = [8, 8], strides = [1, 1]} : vector<8x32xbf16> to vector<8x8xbf16>
    %cst_22 = arith.constant dense<0.000000e+00> : vector<8x8xf32>
    %45 = tpu.matmul %43, %44, %cst_22 {dimension_numbers = #tpu.dot_dimension_numbers<[1], [1], [0], [0], [0, 0, 1, 0], [], []>} : vector<8x8xbf16>, vector<8x8xbf16>, vector<8x8xf32> -> vector<8x8xf32>
    %cst_23 = arith.constant dense<0xFF800000> : vector<8xf32>
    %46 = vector.multi_reduction <maximumf>, %45, %cst_23 [1] : vector<8x8xf32> to vector<8xf32>
    %47 = vector.shape_cast %46 : vector<8xf32> to vector<8x1xf32>
    %48 = vector.broadcast %47 : vector<8x1xf32> to vector<8x8xf32>
    %49 = arith.subf %45, %48 : vector<8x8xf32>
    %50 = math.exp %49 : vector<8x8xf32>
    %cst_24 = arith.constant dense<0.000000e+00> : vector<8xf32>
    %51 = vector.multi_reduction <add>, %50, %cst_24 [1] : vector<8x8xf32> to vector<8xf32>
    %52 = vector.shape_cast %51 : vector<8xf32> to vector<8x1xf32>
    %53 = vector.broadcast %52 : vector<8x1xf32> to vector<8x8xf32>
    %54 = arith.divf %50, %53 : vector<8x8xf32>
    %55 = arith.truncf %54 : vector<8x8xf32> to vector<8x8xbf16>
    %56 = vector.extract_strided_slice %23 {offsets = [0, 8], sizes = [8, 8], strides = [1, 1]} : vector<8x32xbf16> to vector<8x8xbf16>
    %cst_25 = arith.constant dense<0.000000e+00> : vector<8x8xf32>
    %57 = tpu.matmul %55, %56, %cst_25 {dimension_numbers = #tpu.dot_dimension_numbers<[1], [0], [0], [1], [0, 0, 1, 1], [], []>} : vector<8x8xbf16>, vector<8x8xbf16>, vector<8x8xf32> -> vector<8x8xf32>
    %58 = arith.truncf %57 : vector<8x8xf32> to vector<8x8xbf16>
    %c1 = arith.constant 1 : index
    %c0_26 = arith.constant 0 : index
    %c0_27 = arith.constant 0 : index
    %59 = vector.load %arg6[%c1, %c0_26, %c0_27] : memref<4x8x32xbf16, #tpu.memory_space<vmem>>, vector<1x8x32xbf16>
    %60 = vector.shape_cast %59 : vector<1x8x32xbf16> to vector<8x32xbf16>
    %cst_28 = arith.constant dense<0.000000e+00> : vector<8x32xf32>
    %61 = tpu.matmul %58, %60, %cst_28 {dimension_numbers = #tpu.dot_dimension_numbers<[1], [0], [0], [1], [0, 0, 1, 1], [], []>} : vector<8x8xbf16>, vector<8x32xbf16>, vector<8x32xf32> -> vector<8x32xf32>
    %62 = arith.addf %42, %61 : vector<8x32xf32>
    %63 = vector.extract_strided_slice %21 {offsets = [0, 16], sizes = [8, 8], strides = [1, 1]} : vector<8x32xbf16> to vector<8x8xbf16>
    %64 = vector.extract_strided_slice %22 {offsets = [0, 16], sizes = [8, 8], strides = [1, 1]} : vector<8x32xbf16> to vector<8x8xbf16>
    %cst_29 = arith.constant dense<0.000000e+00> : vector<8x8xf32>
    %65 = tpu.matmul %63, %64, %cst_29 {dimension_numbers = #tpu.dot_dimension_numbers<[1], [1], [0], [0], [0, 0, 1, 0], [], []>} : vector<8x8xbf16>, vector<8x8xbf16>, vector<8x8xf32> -> vector<8x8xf32>
    %cst_30 = arith.constant dense<0xFF800000> : vector<8xf32>
    %66 = vector.multi_reduction <maximumf>, %65, %cst_30 [1] : vector<8x8xf32> to vector<8xf32>
    %67 = vector.shape_cast %66 : vector<8xf32> to vector<8x1xf32>
    %68 = vector.broadcast %67 : vector<8x1xf32> to vector<8x8xf32>
    %69 = arith.subf %65, %68 : vector<8x8xf32>
    %70 = math.exp %69 : vector<8x8xf32>
    %cst_31 = arith.constant dense<0.000000e+00> : vector<8xf32>
    %71 = vector.multi_reduction <add>, %70, %cst_31 [1] : vector<8x8xf32> to vector<8xf32>
    %72 = vector.shape_cast %71 : vector<8xf32> to vector<8x1xf32>
    %73 = vector.broadcast %72 : vector<8x1xf32> to vector<8x8xf32>
    %74 = arith.divf %70, %73 : vector<8x8xf32>
    %75 = arith.truncf %74 : vector<8x8xf32> to vector<8x8xbf16>
    %76 = vector.extract_strided_slice %23 {offsets = [0, 16], sizes = [8, 8], strides = [1, 1]} : vector<8x32xbf16> to vector<8x8xbf16>
    %cst_32 = arith.constant dense<0.000000e+00> : vector<8x8xf32>
    %77 = tpu.matmul %75, %76, %cst_32 {dimension_numbers = #tpu.dot_dimension_numbers<[1], [0], [0], [1], [0, 0, 1, 1], [], []>} : vector<8x8xbf16>, vector<8x8xbf16>, vector<8x8xf32> -> vector<8x8xf32>
    %78 = arith.truncf %77 : vector<8x8xf32> to vector<8x8xbf16>
    %c2 = arith.constant 2 : index
    %c0_33 = arith.constant 0 : index
    %c0_34 = arith.constant 0 : index
    %79 = vector.load %arg6[%c2, %c0_33, %c0_34] : memref<4x8x32xbf16, #tpu.memory_space<vmem>>, vector<1x8x32xbf16>
    %80 = vector.shape_cast %79 : vector<1x8x32xbf16> to vector<8x32xbf16>
    %cst_35 = arith.constant dense<0.000000e+00> : vector<8x32xf32>
    %81 = tpu.matmul %78, %80, %cst_35 {dimension_numbers = #tpu.dot_dimension_numbers<[1], [0], [0], [1], [0, 0, 1, 1], [], []>} : vector<8x8xbf16>, vector<8x32xbf16>, vector<8x32xf32> -> vector<8x32xf32>
    %82 = arith.addf %62, %81 : vector<8x32xf32>
    %83 = vector.extract_strided_slice %21 {offsets = [0, 24], sizes = [8, 8], strides = [1, 1]} : vector<8x32xbf16> to vector<8x8xbf16>
    %84 = vector.extract_strided_slice %22 {offsets = [0, 24], sizes = [8, 8], strides = [1, 1]} : vector<8x32xbf16> to vector<8x8xbf16>
    %cst_36 = arith.constant dense<0.000000e+00> : vector<8x8xf32>
    %85 = tpu.matmul %83, %84, %cst_36 {dimension_numbers = #tpu.dot_dimension_numbers<[1], [1], [0], [0], [0, 0, 1, 0], [], []>} : vector<8x8xbf16>, vector<8x8xbf16>, vector<8x8xf32> -> vector<8x8xf32>
    %cst_37 = arith.constant dense<0xFF800000> : vector<8xf32>
    %86 = vector.multi_reduction <maximumf>, %85, %cst_37 [1] : vector<8x8xf32> to vector<8xf32>
    %87 = vector.shape_cast %86 : vector<8xf32> to vector<8x1xf32>
    %88 = vector.broadcast %87 : vector<8x1xf32> to vector<8x8xf32>
    %89 = arith.subf %85, %88 : vector<8x8xf32>
    %90 = math.exp %89 : vector<8x8xf32>
    %cst_38 = arith.constant dense<0.000000e+00> : vector<8xf32>
    %91 = vector.multi_reduction <add>, %90, %cst_38 [1] : vector<8x8xf32> to vector<8xf32>
    %92 = vector.shape_cast %91 : vector<8xf32> to vector<8x1xf32>
    %93 = vector.broadcast %92 : vector<8x1xf32> to vector<8x8xf32>
    %94 = arith.divf %90, %93 : vector<8x8xf32>
    %95 = arith.truncf %94 : vector<8x8xf32> to vector<8x8xbf16>
    %96 = vector.extract_strided_slice %23 {offsets = [0, 24], sizes = [8, 8], strides = [1, 1]} : vector<8x32xbf16> to vector<8x8xbf16>
    %cst_39 = arith.constant dense<0.000000e+00> : vector<8x8xf32>
    %97 = tpu.matmul %95, %96, %cst_39 {dimension_numbers = #tpu.dot_dimension_numbers<[1], [0], [0], [1], [0, 0, 1, 1], [], []>} : vector<8x8xbf16>, vector<8x8xbf16>, vector<8x8xf32> -> vector<8x8xf32>
    %98 = arith.truncf %97 : vector<8x8xf32> to vector<8x8xbf16>
    %c3 = arith.constant 3 : index
    %c0_40 = arith.constant 0 : index
    %c0_41 = arith.constant 0 : index
    %99 = vector.load %arg6[%c3, %c0_40, %c0_41] : memref<4x8x32xbf16, #tpu.memory_space<vmem>>, vector<1x8x32xbf16>
    %100 = vector.shape_cast %99 : vector<1x8x32xbf16> to vector<8x32xbf16>
    %cst_42 = arith.constant dense<0.000000e+00> : vector<8x32xf32>
    %101 = tpu.matmul %98, %100, %cst_42 {dimension_numbers = #tpu.dot_dimension_numbers<[1], [0], [0], [1], [0, 0, 1, 1], [], []>} : vector<8x8xbf16>, vector<8x32xbf16>, vector<8x32xf32> -> vector<8x32xf32>
    %102 = arith.addf %82, %101 : vector<8x32xf32>
    %103 = vector.broadcast %20 : vector<1x32xf32> to vector<8x32xf32>
    %104 = arith.addf %102, %103 : vector<8x32xf32>
    %105 = arith.addf %3, %104 : vector<8x32xf32>
    %106 = vector.extract_strided_slice %1 {offsets = [0, 0], sizes = [1, 32], strides = [1, 1]} : vector<6x32xf32> to vector<1x32xf32>
    %107 = vector.extract_strided_slice %1 {offsets = [1, 0], sizes = [1, 32], strides = [1, 1]} : vector<6x32xf32> to vector<1x32xf32>
    %cst_43 = arith.constant dense<0.000000e+00> : vector<8xf32>
    %108 = vector.multi_reduction <add>, %105, %cst_43 [1] : vector<8x32xf32> to vector<8xf32>
    %109 = vector.shape_cast %108 : vector<8xf32> to vector<8x1xf32>
    %cst_44 = arith.constant 3.200000e+01 : f32
    %110 = vector.broadcast %cst_44 : f32 to vector<8x1xf32>
    %111 = arith.divf %109, %110 : vector<8x1xf32>
    %112 = vector.broadcast %111 : vector<8x1xf32> to vector<8x32xf32>
    %113 = arith.subf %105, %112 : vector<8x32xf32>
    %114 = arith.mulf %113, %113 : vector<8x32xf32>
    %cst_45 = arith.constant dense<0.000000e+00> : vector<8xf32>
    %115 = vector.multi_reduction <add>, %114, %cst_45 [1] : vector<8x32xf32> to vector<8xf32>
    %116 = vector.shape_cast %115 : vector<8xf32> to vector<8x1xf32>
    %cst_46 = arith.constant 3.200000e+01 : f32
    %117 = vector.broadcast %cst_46 : f32 to vector<8x1xf32>
    %118 = arith.divf %116, %117 : vector<8x1xf32>
    %119 = vector.broadcast %111 : vector<8x1xf32> to vector<8x32xf32>
    %120 = arith.subf %105, %119 : vector<8x32xf32>
    %cst_47 = arith.constant 9.99999974E-6 : f32
    %121 = vector.broadcast %cst_47 : f32 to vector<8x1xf32>
    %122 = arith.addf %118, %121 : vector<8x1xf32>
    %123 = math.rsqrt %122 : vector<8x1xf32>
    %124 = vector.broadcast %123 : vector<8x1xf32> to vector<8x32xf32>
    %125 = arith.mulf %120, %124 : vector<8x32xf32>
    %126 = vector.broadcast %106 : vector<1x32xf32> to vector<8x32xf32>
    %127 = arith.mulf %125, %126 : vector<8x32xf32>
    %128 = vector.broadcast %107 : vector<1x32xf32> to vector<8x32xf32>
    %129 = arith.addf %127, %128 : vector<8x32xf32>
    %c0_48 = arith.constant 0 : index
    %c0_49 = arith.constant 0 : index
    %c0_50 = arith.constant 0 : index
    %130 = vector.load %arg2[%c0_48, %c0_49, %c0_50] : memref<1x16x32xf32, #tpu.memory_space<vmem>>, vector<1x16x32xf32>
    %131 = vector.shape_cast %130 : vector<1x16x32xf32> to vector<16x32xf32>
    %132 = arith.truncf %131 : vector<16x32xf32> to vector<16x32xbf16>
    %133 = arith.truncf %129 : vector<8x32xf32> to vector<8x32xbf16>
    %c0_51 = arith.constant 0 : index
    %c0_52 = arith.constant 0 : index
    %134 = vector.load %arg7[%c0_51, %c0_52] : memref<32x32xbf16, #tpu.memory_space<vmem>>, vector<32x32xbf16>
    %cst_53 = arith.constant dense<0.000000e+00> : vector<8x32xf32>
    %135 = tpu.matmul %133, %134, %cst_53 {dimension_numbers = #tpu.dot_dimension_numbers<[1], [0], [0], [1], [0, 0, 1, 1], [], []>} : vector<8x32xbf16>, vector<32x32xbf16>, vector<8x32xf32> -> vector<8x32xf32>
    %136 = vector.extract_strided_slice %0 {offsets = [4, 0], sizes = [1, 32], strides = [1, 1]} : vector<9x32xf32> to vector<1x32xf32>
    %137 = vector.broadcast %136 : vector<1x32xf32> to vector<8x32xf32>
    %138 = arith.addf %135, %137 : vector<8x32xf32>
    %c0_54 = arith.constant 0 : index
    %c0_55 = arith.constant 0 : index
    %139 = vector.load %arg8[%c0_54, %c0_55] : memref<32x32xbf16, #tpu.memory_space<vmem>>, vector<32x32xbf16>
    %cst_56 = arith.constant dense<0.000000e+00> : vector<16x32xf32>
    %140 = tpu.matmul %132, %139, %cst_56 {dimension_numbers = #tpu.dot_dimension_numbers<[1], [0], [0], [1], [0, 0, 1, 1], [], []>} : vector<16x32xbf16>, vector<32x32xbf16>, vector<16x32xf32> -> vector<16x32xf32>
    %141 = vector.extract_strided_slice %0 {offsets = [5, 0], sizes = [1, 32], strides = [1, 1]} : vector<9x32xf32> to vector<1x32xf32>
    %142 = vector.broadcast %141 : vector<1x32xf32> to vector<16x32xf32>
    %143 = arith.addf %140, %142 : vector<16x32xf32>
    %c0_57 = arith.constant 0 : index
    %c0_58 = arith.constant 0 : index
    %144 = vector.load %arg9[%c0_57, %c0_58] : memref<32x32xbf16, #tpu.memory_space<vmem>>, vector<32x32xbf16>
    %cst_59 = arith.constant dense<0.000000e+00> : vector<16x32xf32>
    %145 = tpu.matmul %132, %144, %cst_59 {dimension_numbers = #tpu.dot_dimension_numbers<[1], [0], [0], [1], [0, 0, 1, 1], [], []>} : vector<16x32xbf16>, vector<32x32xbf16>, vector<16x32xf32> -> vector<16x32xf32>
    %146 = vector.extract_strided_slice %0 {offsets = [6, 0], sizes = [1, 32], strides = [1, 1]} : vector<9x32xf32> to vector<1x32xf32>
    %147 = vector.broadcast %146 : vector<1x32xf32> to vector<16x32xf32>
    %148 = arith.addf %145, %147 : vector<16x32xf32>
    %149 = vector.extract_strided_slice %0 {offsets = [7, 0], sizes = [1, 32], strides = [1, 1]} : vector<9x32xf32> to vector<1x32xf32>
    %150 = arith.truncf %138 : vector<8x32xf32> to vector<8x32xbf16>
    %151 = arith.truncf %143 : vector<16x32xf32> to vector<16x32xbf16>
    %152 = arith.truncf %148 : vector<16x32xf32> to vector<16x32xbf16>
    %153 = vector.extract_strided_slice %150 {offsets = [0, 0], sizes = [8, 8], strides = [1, 1]} : vector<8x32xbf16> to vector<8x8xbf16>
    %154 = vector.extract_strided_slice %151 {offsets = [0, 0], sizes = [16, 8], strides = [1, 1]} : vector<16x32xbf16> to vector<16x8xbf16>
    %cst_60 = arith.constant dense<0.000000e+00> : vector<8x16xf32>
    %155 = tpu.matmul %153, %154, %cst_60 {dimension_numbers = #tpu.dot_dimension_numbers<[1], [1], [0], [0], [0, 0, 1, 0], [], []>} : vector<8x8xbf16>, vector<16x8xbf16>, vector<8x16xf32> -> vector<8x16xf32>
    %cst_61 = arith.constant dense<0xFF800000> : vector<8xf32>
    %156 = vector.multi_reduction <maximumf>, %155, %cst_61 [1] : vector<8x16xf32> to vector<8xf32>
    %157 = vector.shape_cast %156 : vector<8xf32> to vector<8x1xf32>
    %158 = vector.broadcast %157 : vector<8x1xf32> to vector<8x16xf32>
    %159 = arith.subf %155, %158 : vector<8x16xf32>
    %160 = math.exp %159 : vector<8x16xf32>
    %cst_62 = arith.constant dense<0.000000e+00> : vector<8xf32>
    %161 = vector.multi_reduction <add>, %160, %cst_62 [1] : vector<8x16xf32> to vector<8xf32>
    %162 = vector.shape_cast %161 : vector<8xf32> to vector<8x1xf32>
    %163 = vector.broadcast %162 : vector<8x1xf32> to vector<8x16xf32>
    %164 = arith.divf %160, %163 : vector<8x16xf32>
    %165 = arith.truncf %164 : vector<8x16xf32> to vector<8x16xbf16>
    %166 = vector.extract_strided_slice %152 {offsets = [0, 0], sizes = [16, 8], strides = [1, 1]} : vector<16x32xbf16> to vector<16x8xbf16>
    %cst_63 = arith.constant dense<0.000000e+00> : vector<8x8xf32>
    %167 = tpu.matmul %165, %166, %cst_63 {dimension_numbers = #tpu.dot_dimension_numbers<[1], [0], [0], [1], [0, 0, 1, 1], [], []>} : vector<8x16xbf16>, vector<16x8xbf16>, vector<8x8xf32> -> vector<8x8xf32>
    %168 = arith.truncf %167 : vector<8x8xf32> to vector<8x8xbf16>
    %c0_64 = arith.constant 0 : index
    %c0_65 = arith.constant 0 : index
    %c0_66 = arith.constant 0 : index
    %169 = vector.load %arg10[%c0_64, %c0_65, %c0_66] : memref<4x8x32xbf16, #tpu.memory_space<vmem>>, vector<1x8x32xbf16>
    %170 = vector.shape_cast %169 : vector<1x8x32xbf16> to vector<8x32xbf16>
    %cst_67 = arith.constant dense<0.000000e+00> : vector<8x32xf32>
    %171 = tpu.matmul %168, %170, %cst_67 {dimension_numbers = #tpu.dot_dimension_numbers<[1], [0], [0], [1], [0, 0, 1, 1], [], []>} : vector<8x8xbf16>, vector<8x32xbf16>, vector<8x32xf32> -> vector<8x32xf32>
    %172 = vector.extract_strided_slice %150 {offsets = [0, 8], sizes = [8, 8], strides = [1, 1]} : vector<8x32xbf16> to vector<8x8xbf16>
    %173 = vector.extract_strided_slice %151 {offsets = [0, 8], sizes = [16, 8], strides = [1, 1]} : vector<16x32xbf16> to vector<16x8xbf16>
    %cst_68 = arith.constant dense<0.000000e+00> : vector<8x16xf32>
    %174 = tpu.matmul %172, %173, %cst_68 {dimension_numbers = #tpu.dot_dimension_numbers<[1], [1], [0], [0], [0, 0, 1, 0], [], []>} : vector<8x8xbf16>, vector<16x8xbf16>, vector<8x16xf32> -> vector<8x16xf32>
    %cst_69 = arith.constant dense<0xFF800000> : vector<8xf32>
    %175 = vector.multi_reduction <maximumf>, %174, %cst_69 [1] : vector<8x16xf32> to vector<8xf32>
    %176 = vector.shape_cast %175 : vector<8xf32> to vector<8x1xf32>
    %177 = vector.broadcast %176 : vector<8x1xf32> to vector<8x16xf32>
    %178 = arith.subf %174, %177 : vector<8x16xf32>
    %179 = math.exp %178 : vector<8x16xf32>
    %cst_70 = arith.constant dense<0.000000e+00> : vector<8xf32>
    %180 = vector.multi_reduction <add>, %179, %cst_70 [1] : vector<8x16xf32> to vector<8xf32>
    %181 = vector.shape_cast %180 : vector<8xf32> to vector<8x1xf32>
    %182 = vector.broadcast %181 : vector<8x1xf32> to vector<8x16xf32>
    %183 = arith.divf %179, %182 : vector<8x16xf32>
    %184 = arith.truncf %183 : vector<8x16xf32> to vector<8x16xbf16>
    %185 = vector.extract_strided_slice %152 {offsets = [0, 8], sizes = [16, 8], strides = [1, 1]} : vector<16x32xbf16> to vector<16x8xbf16>
    %cst_71 = arith.constant dense<0.000000e+00> : vector<8x8xf32>
    %186 = tpu.matmul %184, %185, %cst_71 {dimension_numbers = #tpu.dot_dimension_numbers<[1], [0], [0], [1], [0, 0, 1, 1], [], []>} : vector<8x16xbf16>, vector<16x8xbf16>, vector<8x8xf32> -> vector<8x8xf32>
    %187 = arith.truncf %186 : vector<8x8xf32> to vector<8x8xbf16>
    %c1_72 = arith.constant 1 : index
    %c0_73 = arith.constant 0 : index
    %c0_74 = arith.constant 0 : index
    %188 = vector.load %arg10[%c1_72, %c0_73, %c0_74] : memref<4x8x32xbf16, #tpu.memory_space<vmem>>, vector<1x8x32xbf16>
    %189 = vector.shape_cast %188 : vector<1x8x32xbf16> to vector<8x32xbf16>
    %cst_75 = arith.constant dense<0.000000e+00> : vector<8x32xf32>
    %190 = tpu.matmul %187, %189, %cst_75 {dimension_numbers = #tpu.dot_dimension_numbers<[1], [0], [0], [1], [0, 0, 1, 1], [], []>} : vector<8x8xbf16>, vector<8x32xbf16>, vector<8x32xf32> -> vector<8x32xf32>
    %191 = arith.addf %171, %190 : vector<8x32xf32>
    %192 = vector.extract_strided_slice %150 {offsets = [0, 16], sizes = [8, 8], strides = [1, 1]} : vector<8x32xbf16> to vector<8x8xbf16>
    %193 = vector.extract_strided_slice %151 {offsets = [0, 16], sizes = [16, 8], strides = [1, 1]} : vector<16x32xbf16> to vector<16x8xbf16>
    %cst_76 = arith.constant dense<0.000000e+00> : vector<8x16xf32>
    %194 = tpu.matmul %192, %193, %cst_76 {dimension_numbers = #tpu.dot_dimension_numbers<[1], [1], [0], [0], [0, 0, 1, 0], [], []>} : vector<8x8xbf16>, vector<16x8xbf16>, vector<8x16xf32> -> vector<8x16xf32>
    %cst_77 = arith.constant dense<0xFF800000> : vector<8xf32>
    %195 = vector.multi_reduction <maximumf>, %194, %cst_77 [1] : vector<8x16xf32> to vector<8xf32>
    %196 = vector.shape_cast %195 : vector<8xf32> to vector<8x1xf32>
    %197 = vector.broadcast %196 : vector<8x1xf32> to vector<8x16xf32>
    %198 = arith.subf %194, %197 : vector<8x16xf32>
    %199 = math.exp %198 : vector<8x16xf32>
    %cst_78 = arith.constant dense<0.000000e+00> : vector<8xf32>
    %200 = vector.multi_reduction <add>, %199, %cst_78 [1] : vector<8x16xf32> to vector<8xf32>
    %201 = vector.shape_cast %200 : vector<8xf32> to vector<8x1xf32>
    %202 = vector.broadcast %201 : vector<8x1xf32> to vector<8x16xf32>
    %203 = arith.divf %199, %202 : vector<8x16xf32>
    %204 = arith.truncf %203 : vector<8x16xf32> to vector<8x16xbf16>
    %205 = vector.extract_strided_slice %152 {offsets = [0, 16], sizes = [16, 8], strides = [1, 1]} : vector<16x32xbf16> to vector<16x8xbf16>
    %cst_79 = arith.constant dense<0.000000e+00> : vector<8x8xf32>
    %206 = tpu.matmul %204, %205, %cst_79 {dimension_numbers = #tpu.dot_dimension_numbers<[1], [0], [0], [1], [0, 0, 1, 1], [], []>} : vector<8x16xbf16>, vector<16x8xbf16>, vector<8x8xf32> -> vector<8x8xf32>
    %207 = arith.truncf %206 : vector<8x8xf32> to vector<8x8xbf16>
    %c2_80 = arith.constant 2 : index
    %c0_81 = arith.constant 0 : index
    %c0_82 = arith.constant 0 : index
    %208 = vector.load %arg10[%c2_80, %c0_81, %c0_82] : memref<4x8x32xbf16, #tpu.memory_space<vmem>>, vector<1x8x32xbf16>
    %209 = vector.shape_cast %208 : vector<1x8x32xbf16> to vector<8x32xbf16>
    %cst_83 = arith.constant dense<0.000000e+00> : vector<8x32xf32>
    %210 = tpu.matmul %207, %209, %cst_83 {dimension_numbers = #tpu.dot_dimension_numbers<[1], [0], [0], [1], [0, 0, 1, 1], [], []>} : vector<8x8xbf16>, vector<8x32xbf16>, vector<8x32xf32> -> vector<8x32xf32>
    %211 = arith.addf %191, %210 : vector<8x32xf32>
    %212 = vector.extract_strided_slice %150 {offsets = [0, 24], sizes = [8, 8], strides = [1, 1]} : vector<8x32xbf16> to vector<8x8xbf16>
    %213 = vector.extract_strided_slice %151 {offsets = [0, 24], sizes = [16, 8], strides = [1, 1]} : vector<16x32xbf16> to vector<16x8xbf16>
    %cst_84 = arith.constant dense<0.000000e+00> : vector<8x16xf32>
    %214 = tpu.matmul %212, %213, %cst_84 {dimension_numbers = #tpu.dot_dimension_numbers<[1], [1], [0], [0], [0, 0, 1, 0], [], []>} : vector<8x8xbf16>, vector<16x8xbf16>, vector<8x16xf32> -> vector<8x16xf32>
    %cst_85 = arith.constant dense<0xFF800000> : vector<8xf32>
    %215 = vector.multi_reduction <maximumf>, %214, %cst_85 [1] : vector<8x16xf32> to vector<8xf32>
    %216 = vector.shape_cast %215 : vector<8xf32> to vector<8x1xf32>
    %217 = vector.broadcast %216 : vector<8x1xf32> to vector<8x16xf32>
    %218 = arith.subf %214, %217 : vector<8x16xf32>
    %219 = math.exp %218 : vector<8x16xf32>
    %cst_86 = arith.constant dense<0.000000e+00> : vector<8xf32>
    %220 = vector.multi_reduction <add>, %219, %cst_86 [1] : vector<8x16xf32> to vector<8xf32>
    %221 = vector.shape_cast %220 : vector<8xf32> to vector<8x1xf32>
    %222 = vector.broadcast %221 : vector<8x1xf32> to vector<8x16xf32>
    %223 = arith.divf %219, %222 : vector<8x16xf32>
    %224 = arith.truncf %223 : vector<8x16xf32> to vector<8x16xbf16>
    %225 = vector.extract_strided_slice %152 {offsets = [0, 24], sizes = [16, 8], strides = [1, 1]} : vector<16x32xbf16> to vector<16x8xbf16>
    %cst_87 = arith.constant dense<0.000000e+00> : vector<8x8xf32>
    %226 = tpu.matmul %224, %225, %cst_87 {dimension_numbers = #tpu.dot_dimension_numbers<[1], [0], [0], [1], [0, 0, 1, 1], [], []>} : vector<8x16xbf16>, vector<16x8xbf16>, vector<8x8xf32> -> vector<8x8xf32>
    %227 = arith.truncf %226 : vector<8x8xf32> to vector<8x8xbf16>
    %c3_88 = arith.constant 3 : index
    %c0_89 = arith.constant 0 : index
    %c0_90 = arith.constant 0 : index
    %228 = vector.load %arg10[%c3_88, %c0_89, %c0_90] : memref<4x8x32xbf16, #tpu.memory_space<vmem>>, vector<1x8x32xbf16>
    %229 = vector.shape_cast %228 : vector<1x8x32xbf16> to vector<8x32xbf16>
    %cst_91 = arith.constant dense<0.000000e+00> : vector<8x32xf32>
    %230 = tpu.matmul %227, %229, %cst_91 {dimension_numbers = #tpu.dot_dimension_numbers<[1], [0], [0], [1], [0, 0, 1, 1], [], []>} : vector<8x8xbf16>, vector<8x32xbf16>, vector<8x32xf32> -> vector<8x32xf32>
    %231 = arith.addf %211, %230 : vector<8x32xf32>
    %232 = vector.broadcast %149 : vector<1x32xf32> to vector<8x32xf32>
    %233 = arith.addf %231, %232 : vector<8x32xf32>
    %234 = arith.addf %129, %233 : vector<8x32xf32>
    %235 = vector.extract_strided_slice %1 {offsets = [2, 0], sizes = [1, 32], strides = [1, 1]} : vector<6x32xf32> to vector<1x32xf32>
    %236 = vector.extract_strided_slice %1 {offsets = [3, 0], sizes = [1, 32], strides = [1, 1]} : vector<6x32xf32> to vector<1x32xf32>
    %cst_92 = arith.constant dense<0.000000e+00> : vector<8xf32>
    %237 = vector.multi_reduction <add>, %234, %cst_92 [1] : vector<8x32xf32> to vector<8xf32>
    %238 = vector.shape_cast %237 : vector<8xf32> to vector<8x1xf32>
    %cst_93 = arith.constant 3.200000e+01 : f32
    %239 = vector.broadcast %cst_93 : f32 to vector<8x1xf32>
    %240 = arith.divf %238, %239 : vector<8x1xf32>
    %241 = vector.broadcast %240 : vector<8x1xf32> to vector<8x32xf32>
    %242 = arith.subf %234, %241 : vector<8x32xf32>
    %243 = arith.mulf %242, %242 : vector<8x32xf32>
    %cst_94 = arith.constant dense<0.000000e+00> : vector<8xf32>
    %244 = vector.multi_reduction <add>, %243, %cst_94 [1] : vector<8x32xf32> to vector<8xf32>
    %245 = vector.shape_cast %244 : vector<8xf32> to vector<8x1xf32>
    %cst_95 = arith.constant 3.200000e+01 : f32
    %246 = vector.broadcast %cst_95 : f32 to vector<8x1xf32>
    %247 = arith.divf %245, %246 : vector<8x1xf32>
    %248 = vector.broadcast %240 : vector<8x1xf32> to vector<8x32xf32>
    %249 = arith.subf %234, %248 : vector<8x32xf32>
    %cst_96 = arith.constant 9.99999974E-6 : f32
    %250 = vector.broadcast %cst_96 : f32 to vector<8x1xf32>
    %251 = arith.addf %247, %250 : vector<8x1xf32>
    %252 = math.rsqrt %251 : vector<8x1xf32>
    %253 = vector.broadcast %252 : vector<8x1xf32> to vector<8x32xf32>
    %254 = arith.mulf %249, %253 : vector<8x32xf32>
    %255 = vector.broadcast %235 : vector<1x32xf32> to vector<8x32xf32>
    %256 = arith.mulf %254, %255 : vector<8x32xf32>
    %257 = vector.broadcast %236 : vector<1x32xf32> to vector<8x32xf32>
    %258 = arith.addf %256, %257 : vector<8x32xf32>
    %259 = arith.truncf %258 : vector<8x32xf32> to vector<8x32xbf16>
    %c0_97 = arith.constant 0 : index
    %c0_98 = arith.constant 0 : index
    %260 = vector.load %arg11[%c0_97, %c0_98] : memref<32x64xbf16, #tpu.memory_space<vmem>>, vector<32x64xbf16>
    %cst_99 = arith.constant dense<0.000000e+00> : vector<8x64xf32>
    %261 = tpu.matmul %259, %260, %cst_99 {dimension_numbers = #tpu.dot_dimension_numbers<[1], [0], [0], [1], [0, 0, 1, 1], [], []>} : vector<8x32xbf16>, vector<32x64xbf16>, vector<8x64xf32> -> vector<8x64xf32>
    %c0_100 = arith.constant 0 : index
    %c0_101 = arith.constant 0 : index
    %262 = vector.load %arg14[%c0_100, %c0_101] : memref<1x64xf32, #tpu.memory_space<vmem>>, vector<1x64xf32>
    %263 = vector.broadcast %262 : vector<1x64xf32> to vector<8x64xf32>
    %264 = arith.addf %261, %263 : vector<8x64xf32>
    %cst_102 = arith.constant 0.000000e+00 : f32
    %265 = vector.broadcast %cst_102 : f32 to vector<8x64xf32>
    %266 = arith.maximumf %264, %265 : vector<8x64xf32>
    %267 = arith.truncf %266 : vector<8x64xf32> to vector<8x64xbf16>
    %c0_103 = arith.constant 0 : index
    %c0_104 = arith.constant 0 : index
    %268 = vector.load %arg12[%c0_103, %c0_104] : memref<64x32xbf16, #tpu.memory_space<vmem>>, vector<64x32xbf16>
    %cst_105 = arith.constant dense<0.000000e+00> : vector<8x32xf32>
    %269 = tpu.matmul %267, %268, %cst_105 {dimension_numbers = #tpu.dot_dimension_numbers<[1], [0], [0], [1], [0, 0, 1, 1], [], []>} : vector<8x64xbf16>, vector<64x32xbf16>, vector<8x32xf32> -> vector<8x32xf32>
    %270 = vector.extract_strided_slice %0 {offsets = [8, 0], sizes = [1, 32], strides = [1, 1]} : vector<9x32xf32> to vector<1x32xf32>
    %271 = vector.broadcast %270 : vector<1x32xf32> to vector<8x32xf32>
    %272 = arith.addf %269, %271 : vector<8x32xf32>
    %273 = arith.addf %258, %272 : vector<8x32xf32>
    %274 = vector.extract_strided_slice %1 {offsets = [4, 0], sizes = [1, 32], strides = [1, 1]} : vector<6x32xf32> to vector<1x32xf32>
    %275 = vector.extract_strided_slice %1 {offsets = [5, 0], sizes = [1, 32], strides = [1, 1]} : vector<6x32xf32> to vector<1x32xf32>
    %cst_106 = arith.constant dense<0.000000e+00> : vector<8xf32>
    %276 = vector.multi_reduction <add>, %273, %cst_106 [1] : vector<8x32xf32> to vector<8xf32>
    %277 = vector.shape_cast %276 : vector<8xf32> to vector<8x1xf32>
    %cst_107 = arith.constant 3.200000e+01 : f32
    %278 = vector.broadcast %cst_107 : f32 to vector<8x1xf32>
    %279 = arith.divf %277, %278 : vector<8x1xf32>
    %280 = vector.broadcast %279 : vector<8x1xf32> to vector<8x32xf32>
    %281 = arith.subf %273, %280 : vector<8x32xf32>
    %282 = arith.mulf %281, %281 : vector<8x32xf32>
    %cst_108 = arith.constant dense<0.000000e+00> : vector<8xf32>
    %283 = vector.multi_reduction <add>, %282, %cst_108 [1] : vector<8x32xf32> to vector<8xf32>
    %284 = vector.shape_cast %283 : vector<8xf32> to vector<8x1xf32>
    %cst_109 = arith.constant 3.200000e+01 : f32
    %285 = vector.broadcast %cst_109 : f32 to vector<8x1xf32>
    %286 = arith.divf %284, %285 : vector<8x1xf32>
    %287 = vector.broadcast %279 : vector<8x1xf32> to vector<8x32xf32>
    %288 = arith.subf %273, %287 : vector<8x32xf32>
    %cst_110 = arith.constant 9.99999974E-6 : f32
    %289 = vector.broadcast %cst_110 : f32 to vector<8x1xf32>
    %290 = arith.addf %286, %289 : vector<8x1xf32>
    %291 = math.rsqrt %290 : vector<8x1xf32>
    %292 = vector.broadcast %291 : vector<8x1xf32> to vector<8x32xf32>
    %293 = arith.mulf %288, %292 : vector<8x32xf32>
    %294 = vector.broadcast %274 : vector<1x32xf32> to vector<8x32xf32>
    %295 = arith.mulf %293, %294 : vector<8x32xf32>
    %296 = vector.broadcast %275 : vector<1x32xf32> to vector<8x32xf32>
    %297 = arith.addf %295, %296 : vector<8x32xf32>
    %c0_111 = arith.constant 0 : index
    %c0_112 = arith.constant 0 : index
    %c0_113 = arith.constant 0 : index
    %298 = vector.load %arg16[%c0_111, %c0_112, %c0_113] : memref<1x8x32xf32, #tpu.memory_space<vmem>>, vector<1x8x32xf32>
    %299 = vector.shape_cast %298 : vector<1x8x32xf32> to vector<8x32xf32>
    %300 = vector.shape_cast %297 : vector<8x32xf32> to vector<1x8x32xf32>
    tpu.vector_store %arg16[%c0_111, %c0_112, %c0_113], %300 {strides = array<i32>} : memref<1x8x32xf32, #tpu.memory_space<vmem>>, vector<1x8x32xf32>,
    return
  }
  func.func @transform_0(%arg0: i32) -> (i32, i32, i32) {
    %c0_i32 = arith.constant 0 : i32
    %c0_i32_0 = arith.constant 0 : i32
    %c0_i32_1 = arith.constant 0 : i32
    return %arg0, %c0_i32, %c0_i32_0 : i32, i32, i32
  }
  func.func @transform_1(%arg0: i32) -> (i32, i32, i32) {
    %c0_i32 = arith.constant 0 : i32
    %c0_i32_0 = arith.constant 0 : i32
    %c0_i32_1 = arith.constant 0 : i32
    return %arg0, %c0_i32, %c0_i32_0 : i32, i32, i32
  }
  func.func @transform_2(%arg0: i32) -> (i32, i32) {
    %c0_i32 = arith.constant 0 : i32
    %c0_i32_0 = arith.constant 0 : i32
    %c0_i32_1 = arith.constant 0 : i32
    return %c0_i32, %c0_i32_0 : i32, i32
  }
  func.func @transform_3(%arg0: i32) -> (i32, i32) {
    %c0_i32 = arith.constant 0 : i32
    %c0_i32_0 = arith.constant 0 : i32
    %c0_i32_1 = arith.constant 0 : i32
    return %c0_i32, %c0_i32_0 : i32, i32
  }
  func.func @transform_4(%arg0: i32) -> (i32, i32) {
    %c0_i32 = arith.constant 0 : i32
    %c0_i32_0 = arith.constant 0 : i32
    %c0_i32_1 = arith.constant 0 : i32
    return %c0_i32, %c0_i32_0 : i32, i32
  }
  func.func @transform_5(%arg0: i32) -> (i32, i32, i32) {
    %c0_i32 = arith.constant 0 : i32
    %c0_i32_0 = arith.constant 0 : i32
    %c0_i32_1 = arith.constant 0 : i32
    %c0_i32_2 = arith.constant 0 : i32
    return %c0_i32, %c0_i32_0, %c0_i32_1 : i32, i32, i32
  }
  func.func @transform_6(%arg0: i32) -> (i32, i32) {
    %c0_i32 = arith.constant 0 : i32
    %c0_i32_0 = arith.constant 0 : i32
    %c0_i32_1 = arith.constant 0 : i32
    return %c0_i32, %c0_i32_0 : i32, i32
  }
  func.func @transform_7(%arg0: i32) -> (i32, i32) {
    %c0_i32 = arith.constant 0 : i32
    %c0_i32_0 = arith.constant 0 : i32
    %c0_i32_1 = arith.constant 0 : i32
    return %c0_i32, %c0_i32_0 : i32, i32
  }
  func.func @transform_8(%arg0: i32) -> (i32, i32) {
    %c0_i32 = arith.constant 0 : i32
    %c0_i32_0 = arith.constant 0 : i32
    %c0_i32_1 = arith.constant 0 : i32
    return %c0_i32, %c0_i32_0 : i32, i32
  }
  func.func @transform_9(%arg0: i32) -> (i32, i32, i32) {
    %c0_i32 = arith.constant 0 : i32
    %c0_i32_0 = arith.constant 0 : i32
    %c0_i32_1 = arith.constant 0 : i32
    %c0_i32_2 = arith.constant 0 : i32
    return %c0_i32, %c0_i32_0, %c0_i32_1 : i32, i32, i32
  }
  func.func @transform_10(%arg0: i32) -> (i32, i32) {
    %c0_i32 = arith.constant 0 : i32
    %c0_i32_0 = arith.constant 0 : i32
    %c0_i32_1 = arith.constant 0 : i32
    return %c0_i32, %c0_i32_0 : i32, i32
  }
  func.func @transform_11(%arg0: i32) -> (i32, i32) {
    %c0_i32 = arith.constant 0 : i32
    %c0_i32_0 = arith.constant 0 : i32
    %c0_i32_1 = arith.constant 0 : i32
    return %c0_i32, %c0_i32_0 : i32, i32
  }
  func.func @transform_12(%arg0: i32) -> (i32, i32) {
    %c0_i32 = arith.constant 0 : i32
    %c0_i32_0 = arith.constant 0 : i32
    %c0_i32_1 = arith.constant 0 : i32
    return %c0_i32, %c0_i32_0 : i32, i32
  }
  func.func @transform_13(%arg0: i32) -> (i32, i32) {
    %c0_i32 = arith.constant 0 : i32
    %c0_i32_0 = arith.constant 0 : i32
    %c0_i32_1 = arith.constant 0 : i32
    return %c0_i32, %c0_i32_0 : i32, i32
  }
  func.func @transform_14(%arg0: i32) -> (i32, i32) {
    %c0_i32 = arith.constant 0 : i32
    %c0_i32_0 = arith.constant 0 : i32
    %c0_i32_1 = arith.constant 0 : i32
    return %c0_i32, %c0_i32_0 : i32, i32
  }
  func.func @transform_15(%arg0: i32) -> (i32, i32, i32) {
    %c0_i32 = arith.constant 0 : i32
    %c0_i32_0 = arith.constant 0 : i32
    %c0_i32_1 = arith.constant 0 : i32
    return %arg0, %c0_i32, %c0_i32_0 : i32, i32, i32
  }
}

</mosaic_0001>

<bundles_post_ra>
// kernel: tpu_custom_call.1
= control target key start
LH: loop header
LB: loop body
LE: loop exit
PB: predicated region body
PF: predicated region fallthrough
CT: control target
= control target key end

     0   :  { %s4382_s0 = inlined_call_operand.vmem [shape: f32[2,8,32], index: 0, kind: input, shape index: {}]   ;;  %s4383_s1 = inlined_call_operand.vmem [shape: f32[2,16,32], index: 1, kind: input, shape index: {}]   ;;  %s4384_s2 = inlined_call_operand.hbm [shape: bf16[32,32], index: 2, kind: input, shape index: {}]   ;;  %s4385_s3 = inlined_call_operand.hbm [shape: bf16[32,32], index: 3, kind: input, shape index: {}]   ;;  %s4386_s4 = inlined_call_operand.hbm [shape: bf16[32,32], index: 4, kind: input, shape index: {}]   ;;  %s4387_s5 = inlined_call_operand.hbm [shape: bf16[4,8,32], index: 5, kind: input, shape index: {}]   ;;  %s4388_s6 = inlined_call_operand.hbm [shape: bf16[32,32], index: 6, kind: input, shape index: {}]   ;;  %s4389_s7 = inlined_call_operand.hbm [shape: bf16[32,32], index: 7, kind: input, shape index: {}]   ;;  %s4390_s8 = inlined_call_operand.hbm [shape: bf16[32,32], index: 8, kind: input, shape index: {}]   ;;  %s4391_s9 = inlined_call_operand.vmem [shape: bf16[4,8,32], index: 9, kind: input, shape index: {}]   ;;  %s4392_s10 = inlined_call_operand.hbm [shape: bf16[32,64], index: 10, kind: input, shape index: {}]   ;;  %s4393_s11 = inlined_call_operand.vmem [shape: bf16[64,32], index: 11, kind: input, shape index: {}]   ;;  %s4394_s12 = inlined_call_operand.hbm [shape: f32[9,32], index: 12, kind: input, shape index: {}]   ;;  %s4395_s13 = inlined_call_operand.vmem [shape: f32[1,64], index: 13, kind: input, shape index: {}]   ;;  %s4396_s14 = inlined_call_operand.vmem [shape: f32[6,32], index: 14, kind: input, shape index: {}]   ;;  %s4397_s15 = inlined_call_operand.hbm [shape: f32[2,8,32], index: 15, kind: output, shape index: {}]  }
   0x1   :  { %4412 = sst [smem:[#allocation32_spill]] %s4385_s3 }
   0x2   :  { %4413 = sst [smem:[#allocation33_spill]] %s4393_s11 }
   0x3   :  { %4414 = sst [smem:[#allocation34_spill]] %s4395_s13 }
   0x4   :  { %4415 = sst [smem:[#allocation35_spill]] %s4397_s15 }
   0x5   :  { %20 = vsyncpa [#allocation3], 0 }
   0x6   :  { %21 = vsyncpa [#allocation6], 0 }
   0x7   :  { %22 = vsyncpa [#allocation9], 0 }
   0x8   :  { %23 = vsyncpa [#allocation12], 0 }
   0x9   :  { %24 = vsyncpa [#allocation15], 0 }
   0xa   :  { %25 = vsyncpa [#allocation4], 0 }
   0xb   :  { %27 = vsyncpa [#allocation4 + $0x1], 0  ;;  %s3699_s18 = smov 0   ;;  %s3701_s19 = smov 0  }
   0xc   :  { %s3703_s20 = smov 0   ;;  %s3705_s21 = smov 0  }
   0xd LB: > { %4416 = sst [smem:[#allocation24_spill]] %s3586_s18  ;;  %s3720_s22 = sadd.s32 4294967295, %s3598_s21   ;;  %s3598_s21 = sphi %s3705_s21, %s4451_s21   ;;  %s3594_s20 = sphi %s3703_s20, %s4454_s20   ;;  %s3590_s19 = sphi %s3701_s19, %s4453_s19   ;;  %s3586_s18 = sphi %s3699_s18, %s4452_s18  }
   0xe   : > { %4417 = sst [smem:[#allocation25_spill]] %s3590_s19  ;;  %s2697_s23 = sadd.s32 4294967294, %s3598_s21  }
   0xf   : > { %4418 = sst [smem:[#allocation26_spill]] %s3594_s20  ;;  %s3724_s24 = sadd.s32 1, %s3598_s21  }
  0x10   : > { %4419 = sst [smem:[#allocation27_spill]] %s3598_s21  ;;  %s365_s25 = sadd.s32 1, %s3594_s20 }
  0x11   : > { %4420 = sst [smem:[#allocation28_spill]] %s3724_s24  ;;  %s362_s26 = ssub.s32 %s3598_s21, %s3724_s24 }
  0x12   : > { %p375_p0 = scmp.ne.s32.totalorder %s3594_s20, %s3590_s19  ;;  %p363_p1 = scmp.eq.s32.totalorder %s362_s26, 0 }
  0x13   : > { %p376_p2 = scmp.eq.s32.totalorder %s3720_s22, 1  ;;  %p381_p3 = scmp.ne.s32.totalorder %s3590_s19, %s3586_s18 }
  0x14   : > { %p382_p4 = scmp.eq.s32.totalorder %s2697_s23, 1  ;;  %p2698_p7 = scmp.ge.s32.totalorder %s3598_s21, 1 }
  0x15   : > { %s3735_s27 = scalar_select %p363_p1, %s3594_s20, %s365_s25  }
  0x16   : > { %p3737_p5 = por %p376_p2, %p375_p0  ;;  %p3741_p6 = por %p382_p4, %p381_p3 }
  0x17   : > { %4421 = sst [smem:[#allocation29_spill]] %s3735_s27  ;;  %p389_p8 = scmp.lt.s32.totalorder %s3598_s21, 3 }
  0x18   : > { %s4422_s28 = scalar_select %p3737_p5, 1, 0 }
  0x19   : > { %s4424_s29 = scalar_select %p3741_p6, 1, 0 }
  0x1a   : > { %4423 = sst [smem:[#allocation30_spill]] %s4422_s28  ;;  %p4405_p9 = scmp.eq.s32.totalorder %s3720_s22, 0 }
  0x1b   : > { %4425 = sst [smem:[#allocation31_spill]] %s4424_s29  ;;  %p3748_p10 = pnand %p2698_p7, %p389_p8 }
  0x1c   : > { %s3600_s16 = smov [#allocation5]   ;;  %s3601_s25 = smov [#allocation8]  }
  0x1d   : > { %s4426_s30 = scalar_select %p3748_p10, 1, 0 }
  0x1e   : > { %p3107_p11 = pneg %p3748_p10  ;;  %s414_s17 = sshll.u32 %s3600_s16, 4  ;;  %s3754_s17 = int_to_ptr.vmem [resolvable:$true] %s414_s17 }
  0x1f   : > { %s440_s26 = sshll.u32 %s3601_s25, 4  ;;  %s3602_s27 = smov [#allocation11]   ;;  %s3762_s26 = int_to_ptr.vmem [resolvable:$true] %s440_s26 }
  0x20   : > { %p3758_p12 = pnand %p4405_p9, %p3107_p11  ;;  %s3764_s20 = sshll.u32 %s3602_s27, 4  ;;  %s467_s20 = int_to_ptr.vmem [resolvable:$true] %s3764_s20 }
  0x21   : > { %s4428_s3 = sld [smem:[#allocation32_spill]] }
  0x22   : > { %p3774_p0 = pneg %p3758_p12 }
  0x27   : > { %s3264_s18 = scalar_lea.hbm %s4428_s3, 256 }
  0x28   : > { %p3265_p13 = scmp.ne.s32.totalorder %s4428_s3, %s3264_s18  ;;  %p3271_p3 = scmp.lt.u32.totalorder %s3264_s18, %s4428_s3 }
  0x2a   : > { %p3267_p1 = pnand %p3774_p0, %p3265_p13 }
  0x2c   : > { %p3268_p2 = pneg %p3267_p1 }
  0x2e   : > { %p3273_p4 = pnand %p3271_p3, %p3268_p2 }
  0x30   : > { %3276 = shalt.err (!%p3273_p4)
}
  0x31   : > { %s3277_s21 = scalar_lea.vmem %s3754_s17, 256  ;;  %p3285_p9 = scmp.lt.s32.totalorder %s3754_s17, %s3754_s17 }
  0x32   : > { %p3278_p7 = scmp.ne.s32.totalorder %s3754_s17, %s3277_s21  ;;  %p3286_p6 = scmp.lt.s32.totalorder %s3277_s21, %s3277_s21 }
  0x34   : > { %p3280_p8 = pnand %p3278_p7, %p3774_p0  ;;  %p3287_p13 = por %p3286_p6, %p3285_p9 }
  0x36   : > { %p3281_p11 = pneg %p3280_p8 }
  0x38   : > { %p3288_p1 = pnand %p3287_p13, %p3281_p11 }
  0x3a   : > { %3291 = shalt.err (!%p3288_p1)
}
  0x3b   : > { %s3603_s24 = smov 64   ;;  %s3604_s18 = smov 4  }
  0x3c   : > { %3113 = dma.hbm_to_vmem [thread:$0]  (!%p3758_p12), %s4428_s3, 256, %s3754_s17, [#allocation6], %s3603_s24, %s3603_s24, %s3604_s18  }
  0x3d   : > { %s3292_s21 = scalar_lea.hbm %s4387_s5, 256 }
  0x3e   : > { %p3293_p6 = scmp.ne.s32.totalorder %s4387_s5, %s3292_s21  ;;  %p3299_p3 = scmp.lt.u32.totalorder %s3292_s21, %s4387_s5 }
  0x40   : > { %p3295_p9 = pnand %p3293_p6, %p3774_p0 }
  0x42   : > { %p3296_p2 = pneg %p3295_p9 }
  0x44   : > { %p3301_p4 = pnand %p3299_p3, %p3296_p2 }
  0x46   : > { %3304 = shalt.err (!%p3301_p4)
}
  0x47   : > { %s3305_s17 = scalar_lea.vmem %s3762_s26, 256  ;;  %p3313_p13 = scmp.lt.s32.totalorder %s3762_s26, %s3762_s26 }
  0x48   : > { %p3306_p7 = scmp.ne.s32.totalorder %s3762_s26, %s3305_s17  ;;  %p3314_p1 = scmp.lt.s32.totalorder %s3305_s17, %s3305_s17 }
  0x4a   : > { %p3308_p8 = pnand %p3306_p7, %p3774_p0  ;;  %p3315_p6 = por %p3314_p1, %p3313_p13 }
  0x4c   : > { %p3309_p11 = pneg %p3308_p8 }
  0x4e   : > { %p3316_p9 = pnand %p3315_p6, %p3309_p11 }
  0x50   : > { %3319 = shalt.err (!%p3316_p9)
}
  0x51   : > { %3119 = dma.hbm_to_vmem [thread:$0]  (!%p3758_p12), %s4387_s5, 256, %s3762_s26, [#allocation9], %s3603_s24, %s3603_s24, %s3604_s18  }
  0x52   : > { %s3320_s29 = scalar_lea.hbm %s4389_s7, 256 }
  0x53   : > { %p3321_p2 = scmp.ne.s32.totalorder %s4389_s7, %s3320_s29  ;;  %p3327_p7 = scmp.lt.u32.totalorder %s3320_s29, %s4389_s7 }
  0x55   : > { %p3323_p3 = pnand %p3321_p2, %p3774_p0 }
  0x57   : > { %p3324_p4 = pneg %p3323_p3 }
  0x59   : > { %p3329_p8 = pnand %p3327_p7, %p3324_p4 }
  0x5b   : > { %3332 = shalt.err (!%p3329_p8)
}
  0x5c   : > { %s3333_s17 = scalar_lea.vmem %s467_s20, 256  ;;  %p3341_p6 = scmp.lt.s32.totalorder %s467_s20, %s467_s20 }
  0x5d   : > { %p3334_p11 = scmp.ne.s32.totalorder %s467_s20, %s3333_s17  ;;  %p3342_p9 = scmp.lt.s32.totalorder %s3333_s17, %s3333_s17 }
  0x5f   : > { %p3336_p13 = pnand %p3334_p11, %p3774_p0  ;;  %p3343_p5 = por %p3342_p9, %p3341_p6 }
  0x61   : > { %p3337_p1 = pneg %p3336_p13 }
  0x63   : > { %p3344_p10 = pnand %p3343_p5, %p3337_p1 }
  0x65   : > { %3347 = shalt.err (!%p3344_p10)
}
  0x66   : > { %3125 = dma.hbm_to_vmem [thread:$0]  (!%p3758_p12), %s4389_s7, 256, %s467_s20, [#allocation12], %s3603_s24, %s3603_s24, %s3604_s18  }
  0x67   : > { %s3605_s13 = smov [#allocation14]   ;;  %s3606_s28 = smov [#allocation2]  }
  0x68   : > { %s495_s19 = sshll.u32 %s3605_s13, 4  ;;  %s401_s29 = sshll.u32 %s3606_s28, 4  ;;  %s496_s19 = int_to_ptr.vmem [resolvable:$true] %s495_s19  ;;  %s402_s29 = int_to_ptr.vmem [resolvable:$true] %s401_s29 }
  0x69   : > { %s3348_s27 = scalar_lea.hbm %s4392_s10, 256 }
  0x6a   : > { %p3349_p5 = scmp.ne.s32.totalorder %s4392_s10, %s3348_s27  ;;  %p3355_p3 = scmp.lt.u32.totalorder %s3348_s27, %s4392_s10 }
  0x6c   : > { %p3351_p10 = pnand %p3349_p5, %p3774_p0 }
  0x6e   : > { %p3352_p2 = pneg %p3351_p10 }
  0x70   : > { %p3357_p4 = pnand %p3355_p3, %p3352_p2 }
  0x72   : > { %3360 = shalt.err (!%p3357_p4)
}
  0x73   : > { %s3361_s20 = scalar_lea.vmem %s496_s19, 256  ;;  %p3369_p13 = scmp.lt.s32.totalorder %s496_s19, %s496_s19 }
  0x74   : > { %p3362_p7 = scmp.ne.s32.totalorder %s496_s19, %s3361_s20  ;;  %p3370_p1 = scmp.lt.s32.totalorder %s3361_s20, %s3361_s20 }
  0x76   : > { %p3364_p8 = pnand %p3362_p7, %p3774_p0  ;;  %p3371_p6 = por %p3370_p1, %p3369_p13 }
  0x78   : > { %p3365_p11 = pneg %p3364_p8 }
  0x7a   : > { %p3372_p9 = pnand %p3371_p6, %p3365_p11 }
  0x7c   : > { %3375 = shalt.err (!%p3372_p9)
}
  0x7d   : > { %3131 = dma.hbm_to_vmem [thread:$0]  (!%p3758_p12), %s4392_s10, 256, %s496_s19, [#allocation15], %s3603_s24, %s3603_s24, %s3604_s18  }
  0x7e   : > { %s3376_s16 = scalar_lea.hbm %s4384_s2, 256 }
  0x7f   : > { %p3377_p5 = scmp.ne.s32.totalorder %s4384_s2, %s3376_s16  ;;  %p3383_p3 = scmp.lt.u32.totalorder %s3376_s16, %s4384_s2 }
  0x81   : > { %p3379_p10 = pnand %p3377_p5, %p3774_p0 }
  0x83   : > { %p3380_p2 = pneg %p3379_p10 }
  0x85   : > { %p3385_p4 = pnand %p3383_p3, %p3380_p2 }
  0x87   : > { %3388 = shalt.err (!%p3385_p4)
}
  0x88   : > { %s3389_s26 = scalar_lea.vmem %s402_s29, 256  ;;  %p3397_p13 = scmp.lt.s32.totalorder %s402_s29, %s402_s29 }
  0x89   : > { %p3390_p7 = scmp.ne.s32.totalorder %s402_s29, %s3389_s26  ;;  %p3398_p1 = scmp.lt.s32.totalorder %s3389_s26, %s3389_s26 }
  0x8b   : > { %p3392_p8 = pnand %p3390_p7, %p3774_p0  ;;  %p3399_p6 = por %p3398_p1, %p3397_p13 }
  0x8d   : > { %p3393_p11 = pneg %p3392_p8 }
  0x8f   : > { %p3400_p9 = pnand %p3399_p6, %p3393_p11 }
  0x91   : > { %3403 = shalt.err (!%p3400_p9)
}
  0x92   : > { %3110 = dma.hbm_to_vmem [thread:$0]  (!%p3758_p12), %s4384_s2, 256, %s402_s29, [#allocation3], %s3603_s24, %s3603_s24, %s3604_s18  }
  0x93   : > { %s3607_s3 = smov [#allocation7]   ;;  %s3608_s13 = smov [#allocation10]  }
  0x94   : > { %s427_s11 = sshll.u32 %s3607_s3, 4  ;;  %s453_s28 = sshll.u32 %s3608_s13, 4  ;;  %s428_s11 = int_to_ptr.vmem [resolvable:$true] %s427_s11  ;;  %s454_s28 = int_to_ptr.vmem [resolvable:$true] %s453_s28 }
  0x95   : > { %s3404_s27 = scalar_lea.hbm %s4386_s4, 256 }
  0x96   : > { %p3405_p5 = scmp.ne.s32.totalorder %s4386_s4, %s3404_s27  ;;  %p3411_p3 = scmp.lt.u32.totalorder %s3404_s27, %s4386_s4 }
  0x98   : > { %p3407_p10 = pnand %p3405_p5, %p3774_p0 }
  0x9a   : > { %p3408_p2 = pneg %p3407_p10 }
  0x9c   : > { %p3413_p4 = pnand %p3411_p3, %p3408_p2 }
  0x9e   : > { %3416 = shalt.err (!%p3413_p4)
}
  0x9f   : > { %s3417_s29 = scalar_lea.vmem %s428_s11, 256  ;;  %p3425_p13 = scmp.lt.s32.totalorder %s428_s11, %s428_s11 }
  0xa0   : > { %p3418_p7 = scmp.ne.s32.totalorder %s428_s11, %s3417_s29  ;;  %p3426_p1 = scmp.lt.s32.totalorder %s3417_s29, %s3417_s29 }
  0xa2   : > { %p3420_p8 = pnand %p3418_p7, %p3774_p0  ;;  %p3427_p6 = por %p3426_p1, %p3425_p13 }
  0xa4   : > { %p3421_p11 = pneg %p3420_p8 }
  0xa6   : > { %p3428_p9 = pnand %p3427_p6, %p3421_p11 }
  0xa8   : > { %3431 = shalt.err (!%p3428_p9)
}
  0xa9   : > { %3116 = dma.hbm_to_vmem [thread:$0]  (!%p3758_p12), %s4386_s4, 256, %s428_s11, [#allocation6], %s3603_s24, %s3603_s24, %s3604_s18  }
  0xaa   : > { %s3432_s25 = scalar_lea.hbm %s4388_s6, 256 }
  0xab   : > { %p3433_p5 = scmp.ne.s32.totalorder %s4388_s6, %s3432_s25  ;;  %p3439_p3 = scmp.lt.u32.totalorder %s3432_s25, %s4388_s6 }
  0xad   : > { %p3435_p10 = pnand %p3433_p5, %p3774_p0 }
  0xaf   : > { %p3436_p2 = pneg %p3435_p10 }
  0xb1   : > { %p3441_p4 = pnand %p3439_p3, %p3436_p2 }
  0xb3   : > { %3444 = shalt.err (!%p3441_p4)
}
  0xb4   : > { %s3445_s19 = scalar_lea.vmem %s454_s28, 256  ;;  %p3453_p13 = scmp.lt.s32.totalorder %s454_s28, %s454_s28 }
  0xb5   : > { %p3446_p7 = scmp.ne.s32.totalorder %s454_s28, %s3445_s19  ;;  %p3454_p1 = scmp.lt.s32.totalorder %s3445_s19, %s3445_s19 }
  0xb7   : > { %p3448_p8 = pnand %p3446_p7, %p3774_p0  ;;  %p3455_p6 = por %p3454_p1, %p3453_p13 }
  0xb9   : > { %p3449_p11 = pneg %p3448_p8 }
  0xbb   : > { %p3456_p9 = pnand %p3455_p6, %p3449_p11 }
  0xbd   : > { %3459 = shalt.err (!%p3456_p9)
}
  0xbe   : > { %3122 = dma.hbm_to_vmem [thread:$0]  (!%p3758_p12), %s4388_s6, 256, %s454_s28, [#allocation9], %s3603_s24, %s3603_s24, %s3604_s18  }
  0xbf   : > { %s3609_s20 = smov [#allocation13]   ;;  %s3610_s13 = smov [#allocation16]  }
  0xc0   : > { %s479_s3 = sshll.u32 %s3609_s20, 4  ;;  %s511_s16 = sshll.u32 %s3610_s13, 4  ;;  %s480_s3 = int_to_ptr.vmem [resolvable:$true] %s479_s3  ;;  %s512_s16 = int_to_ptr.vmem [resolvable:$true] %s511_s16 }
  0xc1   : > { %s3460_s21 = scalar_lea.hbm %s4390_s8, 256 }
  0xc2   : > { %p3461_p5 = scmp.ne.s32.totalorder %s4390_s8, %s3460_s21  ;;  %p3467_p3 = scmp.lt.u32.totalorder %s3460_s21, %s4390_s8 }
  0xc4   : > { %p3463_p10 = pnand %p3461_p5, %p3774_p0 }
  0xc6   : > { %p3464_p2 = pneg %p3463_p10 }
  0xc8   : > { %p3469_p4 = pnand %p3467_p3, %p3464_p2 }
  0xca   : > { %3472 = shalt.err (!%p3469_p4)
}
  0xcb   : > { %s3473_s28 = scalar_lea.vmem %s480_s3, 256  ;;  %p3481_p13 = scmp.lt.s32.totalorder %s480_s3, %s480_s3 }
  0xcc   : > { %p3474_p7 = scmp.ne.s32.totalorder %s480_s3, %s3473_s28  ;;  %p3482_p1 = scmp.lt.s32.totalorder %s3473_s28, %s3473_s28 }
  0xce   : > { %p3476_p8 = pnand %p3474_p7, %p3774_p0  ;;  %p3483_p6 = por %p3482_p1, %p3481_p13 }
  0xd0   : > { %p3477_p11 = pneg %p3476_p8 }
  0xd2   : > { %p3484_p9 = pnand %p3483_p6, %p3477_p11 }
  0xd4   : > { %3487 = shalt.err (!%p3484_p9)
}
  0xd5   : > { %3128 = dma.hbm_to_vmem [thread:$0]  (!%p3758_p12), %s4390_s8, 256, %s480_s3, [#allocation12], %s3603_s24, %s3603_s24, %s3604_s18  }
  0xd6   : > { %s3488_s27 = scalar_lea.hbm %s4394_s12, 256 }
  0xd7   : > { %p3489_p5 = scmp.ne.s32.totalorder %s4394_s12, %s3488_s27  ;;  %p3495_p3 = scmp.lt.u32.totalorder %s3488_s27, %s4394_s12 }
  0xd9   : > { %p3491_p10 = pnand %p3489_p5, %p3774_p0 }
  0xdb   : > { %p3492_p2 = pneg %p3491_p10 }
  0xdd   : > { %p3497_p4 = pnand %p3495_p3, %p3492_p2 }
  0xdf   : > { %3500 = shalt.err (!%p3497_p4)
}
  0xe0   : > { %s3501_s11 = scalar_lea.vmem %s512_s16, 256  ;;  %p3509_p13 = scmp.lt.s32.totalorder %s512_s16, %s512_s16 }
  0xe1   : > { %p3502_p7 = scmp.ne.s32.totalorder %s512_s16, %s3501_s11  ;;  %p3510_p1 = scmp.lt.s32.totalorder %s3501_s11, %s3501_s11 }
  0xe3   : > { %p3504_p8 = pnand %p3502_p7, %p3774_p0  ;;  %p3511_p6 = por %p3510_p1, %p3509_p13 }
  0xe5   : > { %p3505_p11 = pneg %p3504_p8 }
  0xe7   : > { %p3512_p9 = pnand %p3511_p6, %p3505_p11 }
  0xe9   : > { %3515 = shalt.err (!%p3512_p9)
}
  0xea   : > { %s3611_s24 = smov 128   ;;  %s3612_s18 = smov 8  }
  0xeb   : > { %3134 = dma.hbm_to_vmem [thread:$0]  (!%p3758_p12), %s4394_s12, 256, %s512_s16, [#allocation15], %s3611_s24, %s3611_s24, %s3612_s18  }
  0xec   : > { %p4430_p5 = scmp.ne.s32.totalorder %s4426_s30, 0 }
  0xed   : > { %p4431_p10 = scmp.eq.s32.totalorder (!%p4430_p5), %s3720_s22, 0 }
  0xee   : > { %548 = sbr.rel (%p4430_p5) target bundleno = 6822 (0x1aa6), region = 80 }
  0xf5   : > { %3561 = dma.done.wait (%p4431_p10), [#allocation3], 256   ;;  %p4432_p0 = pmov %p4431_p10 }
  0xf7   : > { %3563 = vsyncadd (%p4432_p0), [#allocation3], 4294967040  ;;  %p4433_p2 = pmov %p4432_p0 }
  0xf8   : > { %p4434_p3 = pmov %p4432_p0 }
  0xf9   : > { %3565 = dma.done.wait (%p4433_p2), [#allocation6], 512  }
  0xfa   : > { %3567 = vsyncadd (%p4434_p3), [#allocation6], 4294966784  ;;  %p4435_p4 = pmov %p4432_p0 }
  0xfb   : > { %p4436_p12 = pmov %p4432_p0 }
  0xfc   : > { %3569 = dma.done.wait (%p4435_p4), [#allocation9], 512  }
  0xfd   : > { %3571 = vsyncadd (%p4436_p12), [#allocation9], 4294966784  ;;  %p4437_p7 = pmov %p4432_p0 }
  0xfe   : > { %p4438_p8 = pmov %p4432_p0 }
  0xff   : > { %3573 = dma.done.wait (%p4437_p7), [#allocation12], 512  }
 0x100   : > { %3575 = vsyncadd (%p4438_p8), [#allocation12], 4294966784  ;;  %p4439_p11 = pmov %p4432_p0 }
 0x101   : > { %p4440_p13 = pmov %p4432_p0 }
 0x102   : > { %3577 = dma.done.wait (%p4439_p11), [#allocation15], 512  }
 0x103   : > { %3579 = vsyncadd (%p4440_p13), [#allocation15], 4294966784  ;;  %p632_p1 = scmp.lt.s32.totalorder %s3720_s22, 1  ;;  %v3613_v0 = vmov 0.0   ;;  %vm3614_vm0 = vmmov 0   ;;  %v3208_v1 = vld [vmem:[#allocation5] sm:$0xff]   ;;  %v651_v7 = vlaneseq }
 0x104   : > { %2865 = vmatprep.subr.bf16.mxu1 %v3613_v0  ;;  %2857 = vmatprep.subr.bf16.mxu0 %v3613_v0  ;;  %v3209_v2 = vld [vmem:[#allocation5 + $0x8] sm:$0xff]   ;;  %v3210_v3 = vld [vmem:[#allocation2] sm:$0xff]   ;;  %vm667_vm1 = vcmask 261120   ;;  %v3211_v5 = vld [vmem:[#allocation2 + $0x8] sm:$0xff]   ;;  %vm834_vm2 = vcmask 64512   ;;  %s3615_s20 = smov 120  }
 0x105   : > { %2869 = vmatprep.mubr.msk.bf16.mxu1 %vm3614_vm0, %v3613_v0  ;;  %s3997_s15 = scalar_select %p632_p1, %s3720_s22, 1  ;;  %2861 = vmatprep.mubr.msk.bf16.mxu0 %vm3614_vm0, %v3613_v0  ;;  %v4019_v8 = vshrl.u32 %v651_v7, 7  ;;  %v4022_v10 = vld [vmem:[#allocation16] sm:$0xff]  ;;  %v3213_v28 = vld [vmem:[#allocation7 + $0x8] sm:$0xff]   ;;  %vm896_vm3 = vcmask 1043456   ;;  %vm1741_vm4 = vcmask 130048  }
 0x106   : > { %2866 = vmatpush3.bf16.msra.mxu1 %v3208_v1  ;;  %2858 = vmatpush3.bf16.msra.mxu0 %v3210_v3  ;;  %v3212_v27 = vld [vmem:[#allocation7] sm:$0xff]   ;;  %s3616_s13 = smov 112   ;;  %s3617_s25 = smov 104   ;;  %vm2455_vm5 = vcmask 523264  }
 0x107   : > { %s2720_s30 = sshll.u32 %s3997_s15, 3  ;;  %2867 = vmatprep.subr.bf16.mxu1 %v3613_v0  ;;  %2859 = vmatprep.subr.bf16.mxu0 %v3613_v0  ;;  %v717_v9 = vsub.s32 1, %v4019_v8  ;;  %v653_v11 = vsub.s32 0, %v4019_v8  ;;  %v777_v51 = vsub.s32 2, %v4019_v8  ;;  %s2782_s27 = sshll.u32 %s3997_s15, 4 }
 0x108   : > { %s635_s29 = scalar_lea.vmem %s4382_s0, %s2720_s30  ;;  %s640_s26 = scalar_lea.vmem %s4383_s1, %s2782_s27 }
 0x109   : > { %v4006_v4 = vld [vmem:[%s635_s29] sm:$0xff]  ;;  %v718_v12 = vrot.slane %v4022_v10, %v717_v9  ;;  %v654_v13 = vrot.slane %v4022_v10, %v653_v11  ;;  %v778_v52 = vrot.slane %v4022_v10, %v777_v51  ;;  %s4442_s18 = sld [smem:[#allocation34_spill]]  ;;  %s4443_s3 = sld [smem:[#allocation25_spill]] }
 0x10a   : > { %v646_v6 = vpack.c.bf16 %v4006_v4, %v4006_v4  ;;  %2868 = vmatpush3.bf16.msra.mxu1 %v3209_v2  ;;  %2860 = vmatpush3.bf16.msra.mxu0 %v3211_v5  ;;  %v1057_v2 = vld [vmem:[#allocation8 + $0x4] sm:$0xf]  ;;  %s4444_s30 = sld [smem:[#allocation30_spill]]  ;;  %s2779_s23 = sshll.u32 %s3720_s22, 7 }
 0x10b   : > { %2881 = vmatprep.subr.bf16.mxu1 %v3613_v0  ;;  %2873 = vmatprep.subr.bf16.mxu0 %v3613_v0  ;;  %v1062_v3 = vsel %vm896_vm3, %v1057_v2, 0  ;;  %s4445_s27 = sld [smem:[#allocation35_spill]]  ;;  %s3618_s22 = smov [#allocation17]  }
 0x10c   : > { %s3520_s19 = sshll.u32 %s3618_s22, 4  ;;  %s3521_s19 = int_to_ptr.vmem [resolvable:$false] %s3520_s19 }
 0x10d   : > { %2870 = vmatmul.mubr.msk.bf16.vlgmr.msra.gmra.mrb[0].mxu1 %vm667_vm1, %v646_v6  ;;  %2862 = vmatmul.mubr.msk.bf16.vlgmr.msra.gmra.mrb[0].mxu0 %vm667_vm1, %v646_v6  ;;  %s3522_s11 = scalar_lea.vmem %s3521_s19, 256 }
 0x10e   : > { %2883 = vmatprep.mubr.msk.bf16.mxu1 %vm3614_vm0, %v3613_v0  ;;  %2877 = vmatprep.mubr.msk.bf16.mxu0 %vm3614_vm0, %v3613_v0 }
 0x10f   : > { %2874 = vmatpush3.bf16.msra.mxu0 %v3212_v27  ;;  %s629_s28 = sand.u32 1, %s4443_s3  }
 0x110   : > { %2875 = vmatprep.subr.bf16.mxu0 %v3613_v0  ;;  %s2719_s15 = sshll.u32 %s629_s28, 3  ;;  %s2525_s17 = scalar_lea.sflag [#allocation4], %s629_s28 }
 0x111   : > { %s631_s16 = scalar_lea.vmem [#allocation17], %s2719_s15  ;;  %s4339_s21 = scalar_lea.hbm %s4445_s27, %s2779_s23 }
 0x112   : > { %s2538_s29 = sshll.u32 %s631_s16, 4  ;;  %p4446_p9 = scmp.ne.s32.totalorder %s4444_s30, 0  ;;  %s4341_s29 = int_to_ptr.vmem [resolvable:$true] %s2538_s29 }
 0x113   : > { %2876 = vmatpush3.bf16.msra.mxu0 %v3213_v28  ;;  %p3523_p0 = scmp.lt.s32.totalorder %s4341_s29, %s3521_s19 }
 0x114   : > { %2887 = vmatprep.subr.bf16.mxu0 %v3613_v0 }
 0x116   : > { %2878 = vmatmul.mubr.msk.bf16.vlgmr.msra.gmra.mrb[4].mxu0 %vm667_vm1, %v646_v6 }
 0x117   : > { %2889 = vmatprep.mubr.msk.bf16.mxu0 %vm3614_vm0, %v3613_v0 }
 0x1e0   : > { %v765_v14 = vpop.f32.mrb[0].mxu1  ;;  %v705_v18 = vpop.f32.mrb[0].mxu0 }
 0x1e1   : > { %v766_v15 = vadd.f32 %v765_v14, %v718_v12  ;;  %v2871_v16 = vpop.f32.mrb[1].mxu1  ;;  %v706_v21 = vadd.f32 %v705_v18, %v654_v13  ;;  %v2863_v22 = vpop.f32.mrb[1].mxu0  ;;  %v941_v13 = vld [vmem:[#allocation8] sm:$0xf] }
 0x1e2   : > { %v768_v17 = vpop.f32.mrb[2].mxu1  ;;  %v708_v23 = vpop.f32.mrb[2].mxu0  ;;  %v1108_v16 = vsel %vm896_vm3, %v941_v13, 0 }
 0x1e3   : > { %v4031_v19 = vpack.c.bf16 %v766_v15, %v766_v15  ;;  %v2872_v20 = vpop.f32.mrb[3].mxu1  ;;  %v4035_v24 = vpack.c.bf16 %v706_v21, %v706_v21  ;;  %v2864_v26 = vpop.f32.mrb[3].mxu0 }
 0x1e5   : > { %946 = vrot.lane.b32.xlu0 %v4031_v19, %s3615_s20  ;;  %v839_v25 = vsel %vm834_vm2, %v4031_v19, 0 }
 0x1e6   : > { %2882 = vmatpush3.bf16.xpose.msra.mxu1 %v839_v25 }
 0x1e7   : > { %2893 = vmatprep.subr.bf16.mxu1 %v3613_v0 }
 0x1e9   : > { %943 = vrot.lane.b32.xlu0 %v4035_v24, %s3615_s20  ;;  %v825_v45 = vpop.f32.mrb[4].mxu0 }
 0x1ea   : > { %v2879_v46 = vpop.f32.mrb[5].mxu0  ;;  %v826_v53 = vadd.f32 %v825_v45, %v778_v52 }
 0x1eb   : > { %v828_v47 = vpop.f32.mrb[6].mxu0 }
 0x1ec   : > { %v2880_v48 = vpop.f32.mrb[7].mxu0  ;;  %v4063_v54 = vpack.c.bf16 %v826_v53, %v826_v53 }
 0x1ed   : > { %2884 = vmatmul.mubr.msk.bf16.vlgmr.msra.gmra.mrb[4].mxu1 %vm834_vm2, %v4035_v24 }
 0x1ee   : > { %2895 = vmatprep.mubr.msk.bf16.mxu1 %vm3614_vm0, %v3613_v0  ;;  %v898_v55 = vsel %vm896_vm3, %v4063_v54, 0 }
 0x1ef   : > { %2888 = vmatpush3.bf16.msra.mxu0 %v898_v55 }
 0x1f0   : > { %2899 = vmatprep.subr.bf16.mxu0 %v3613_v0 }
 0x257   : > { %v947_v29 = vpop.permute.xlu0 %946 }
 0x258   : > { %v952_v30 = vsel %vm834_vm2, %v947_v29, 0 }
 0x259   : > { %2894 = vmatpush3.bf16.xpose.msra.mxu1 %v952_v30 }
 0x25a   : > { %2905 = vmatprep.subr.bf16.mxu1 %v3613_v0 }
 0x25b   : > { %v944_v31 = vpop.permute.xlu0 %943 }
 0x260   : > { %2896 = vmatmul.mubr.msk.bf16.vlgmr.msra.gmra.mrb[8].mxu1 %vm834_vm2, %v944_v31 }
 0x261   : > { %2907 = vmatprep.mubr.msk.bf16.mxu1 %vm3614_vm0, %v3613_v0  ;;  %2906 = vmatpush3.bf16.msra.mxu1 %v1062_v3 }
 0x262   : > { %2917 = vmatprep.subr.bf16.mxu1 %v3613_v0 }
 0x2c0   : > { %v875_v32 = vpop.f32.mrb[4].mxu1 }
 0x2c1   : > { %v2885_v33 = vpop.f32.mrb[5].mxu1  ;;  %v881_v34 = vsel %vm834_vm2, %v875_v32, -inf }
 0x2c2   : > { %882 = vmax.xlane.f32.xlu1 %v881_v34  ;;  %v878_v35 = vpop.f32.mrb[6].mxu1 }
 0x2c3   : > { %v2886_v36 = vpop.f32.mrb[7].mxu1 }
 0x333   : > { %v988_v37 = vpop.f32.mrb[8].mxu1 }
 0x334   : > { %v2897_v38 = vpop.f32.mrb[9].mxu1  ;;  %v994_v39 = vsel %vm834_vm2, %v988_v37, -inf }
 0x335   : > { %995 = vmax.xlane.f32.xlu1 %v994_v39  ;;  %v991_v40 = vpop.f32.mrb[10].mxu1 }
 0x336   : > { %v2898_v41 = vpop.f32.mrb[11].mxu1 }
 0x34f   : > { %v883_v42 = vpop.xlane.xlu1 %882 }
 0x350   : > { %v884_v43 = vsub.f32 %v875_v32, %v883_v42 }
 0x352   : > { %v885_v44 = vmul.f32 1.442695, %v884_v43 }
 0x354   : > { %3226 = vpow2.f32 %v885_v44 }
 0x35e   : > { %v3227_v49 = vpop.eup %3226 }
 0x35f   : > { %v887_v50 = vsel %vm834_vm2, %v3227_v49, 0.0 }
 0x360   : > { %888 = vadd.xlane.f32.xlu0 %v887_v50 }
 0x376   : > { %1212 = vrot.lane.b32.xlu0 %v4063_v54, %s3616_s13 }
 0x3c2   : > { %v996_v56 = vpop.xlane.xlu1 %995 }
 0x3c3   : > { %v997_v57 = vsub.f32 %v988_v37, %v996_v56 }
 0x3c5   : > { %v998_v58 = vmul.f32 1.442695, %v997_v57 }
 0x3c7   : > { %3228 = vpow2.f32 %v998_v58 }
 0x3d1   : > { %v3229_v59 = vpop.eup %3228 }
 0x3d2   : > { %v1000_v60 = vsel %vm834_vm2, %v3229_v59, 0.0 }
 0x3d3   : > { %1001 = vadd.xlane.f32.xlu1 %v1000_v60 }
 0x3e4   : > { %1007 = vrot.lane.b32.xlu1 %v4063_v54, %s3615_s20 }
 0x3e8   : > { %1152 = vrot.lane.b32.xlu1 %v4031_v19, %s3616_s13 }
 0x3ec   : > { %1150 = vrot.lane.b32.xlu1 %v4035_v24, %s3616_s13 }
 0x3ed   : > { %v889_v61 = vpop.xlane.xlu0 %888 }
 0x3ee   : > { %3230 = vrcp.f32 %v889_v61 }
 0x3f1   : > { %v1213_v17 = vpop.permute.xlu0 %1212 }
 0x3f2   : > { %v1218_v23 = vsel %vm896_vm3, %v1213_v17, 0 }
 0x3f8   : > { %v3231_v62 = vpop.eup %3230 }
 0x3f9   : > { %v891_v63 = vmul.f32 %v3231_v62, %v3227_v49 }
 0x3fb   : > { %v892_v1 = vpack.c.bf16 %v891_v63, %v891_v63 }
 0x3fd   : > { %2890 = vmatmul.mubr.msk.bf16.vlgmr.msra.gmra.mrb[8].mxu0 %vm834_vm2, %v892_v1 }
 0x3fe   : > { %2901 = vmatprep.mubr.msk.bf16.mxu0 %vm3614_vm0, %v3613_v0 }
 0x460   : > { %v1002_v5 = vpop.xlane.xlu1 %1001 }
 0x461   : > { %3232 = vrcp.f32 %v1002_v5 }
 0x464   : > { %v1008_v6 = vpop.permute.xlu1 %1007 }
 0x465   : > { %v1013_v7 = vsel %vm896_vm3, %v1008_v6, 0 }
 0x466   : > { %2900 = vmatpush3.bf16.msra.mxu0 %v1013_v7 }
 0x467   : > { %2911 = vmatprep.subr.bf16.mxu0 %v3613_v0 }
 0x468   : > { %v1153_v26 = vpop.permute.xlu1 %1152 }
 0x469   : > { %v1158_v31 = vsel %vm834_vm2, %v1153_v26, 0 }
 0x46b   : > { %v3233_v12 = vpop.eup %3232 }
 0x46c   : > { %v1004_v14 = vmul.f32 %v3233_v12, %v3229_v59  ;;  %v1151_v33 = vpop.permute.xlu1 %1150 }
 0x46e   : > { %v1005_v15 = vpack.c.bf16 %v1004_v14, %v1004_v14 }
 0x470   : > { %2902 = vmatmul.mubr.msk.bf16.vlgmr.msra.gmra.mrb[12].mxu0 %vm834_vm2, %v1005_v15 }
 0x471   : > { %2912 = vmatpush3.bf16.msra.mxu0 %v1108_v16  ;;  %2913 = vmatprep.mubr.msk.bf16.mxu0 %vm3614_vm0, %v3613_v0 }
 0x472   : > { %2923 = vmatprep.subr.bf16.mxu0 %v3613_v0 }
 0x4d0   : > { %v934_v18 = vpop.f32.mrb[8].mxu0 }
 0x4d1   : > { %v940_v20 = vpack.c.bf16 %v934_v18, %v934_v18  ;;  %v2891_v21 = vpop.f32.mrb[9].mxu0 }
 0x4d2   : > { %v937_v22 = vpop.f32.mrb[10].mxu0 }
 0x4d3   : > { %v2892_v25 = vpop.f32.mrb[11].mxu0  ;;  %2914 = vmatmul.mubr.msk.bf16.vlgmr.msra.gmra.mrb[16].mxu0 %vm834_vm2, %v940_v20  ;;  %v1422_v20 = vld [vmem:[#allocation8 + $0xc] sm:$0xf] }
 0x4d4   : > { %2924 = vmatpush3.bf16.msra.mxu0 %v1218_v23  ;;  %2925 = vmatprep.mubr.msk.bf16.mxu0 %vm3614_vm0, %v3613_v0  ;;  %v1427_v21 = vsel %vm896_vm3, %v1422_v20, 0 }
 0x4d5   : > { %2935 = vmatprep.subr.bf16.mxu0 %v3613_v0 }
 0x543   : > { %v1049_v27 = vpop.f32.mrb[12].mxu0 }
 0x544   : > { %v1055_v28 = vpack.c.bf16 %v1049_v27, %v1049_v27  ;;  %v2903_v29 = vpop.f32.mrb[13].mxu0 }
 0x545   : > { %v1052_v30 = vpop.f32.mrb[14].mxu0 }
 0x546   : > { %v2904_v32 = vpop.f32.mrb[15].mxu0  ;;  %2908 = vmatmul.mubr.msk.bf16.vlgmr.msra.gmra.mrb[12].mxu1 %vm834_vm2, %v1055_v28 }
 0x547   : > { %2918 = vmatpush3.bf16.xpose.msra.mxu1 %v1158_v31  ;;  %2919 = vmatprep.mubr.msk.bf16.mxu1 %vm3614_vm0, %v3613_v0 }
 0x548   : > { %2929 = vmatprep.subr.bf16.mxu1 %v3613_v0 }
 0x54e   : > { %2920 = vmatmul.mubr.msk.bf16.vlgmr.msra.gmra.mrb[16].mxu1 %vm834_vm2, %v1151_v33 }
 0x54f   : > { %2931 = vmatprep.mubr.msk.bf16.mxu1 %vm3614_vm0, %v3613_v0 }
 0x5a6   : > { %v1144_v34 = vpop.f32.mrb[16].mxu0 }
 0x5a7   : > { %v2915_v35 = vpop.f32.mrb[17].mxu0 }
 0x5a8   : > { %v1147_v36 = vpop.f32.mrb[18].mxu0 }
 0x5a9   : > { %v2916_v37 = vpop.f32.mrb[19].mxu0 }
 0x619   : > { %v1098_v38 = vpop.f32.mrb[12].mxu1 }
 0x61a   : > { %v4102_v39 = vadd.f32 %v1144_v34, %v1098_v38  ;;  %v2909_v40 = vpop.f32.mrb[13].mxu1  ;;  %v1472_v38 = vsub.s32 3, %v4019_v8 }
 0x61b   : > { %v1101_v41 = vpop.f32.mrb[14].mxu1 }
 0x61c   : > { %v2910_v42 = vpop.f32.mrb[15].mxu1 }
 0x621   : > { %v1194_v43 = vpop.f32.mrb[16].mxu1 }
 0x622   : > { %v2921_v44 = vpop.f32.mrb[17].mxu1  ;;  %v1200_v45 = vsel %vm834_vm2, %v1194_v43, -inf }
 0x623   : > { %1201 = vmax.xlane.f32.xlu1 %v1200_v45  ;;  %v1197_v46 = vpop.f32.mrb[18].mxu1 }
 0x624   : > { %v2922_v47 = vpop.f32.mrb[19].mxu1 }
 0x6b0   : > { %v1202_v48 = vpop.xlane.xlu1 %1201 }
 0x6b1   : > { %v1203_v49 = vsub.f32 %v1194_v43, %v1202_v48 }
 0x6b3   : > { %v1204_v50 = vmul.f32 1.442695, %v1203_v49 }
 0x6b5   : > { %3234 = vpow2.f32 %v1204_v50 }
 0x6bf   : > { %v3235_v52 = vpop.eup %3234 }
 0x6c0   : > { %v1206_v53 = vsel %vm834_vm2, %v3235_v52, 0.0 }
 0x6c1   : > { %1207 = vadd.xlane.f32.xlu0 %v1206_v53 }
 0x6d7   : > { %1312 = vrot.lane.b32.xlu0 %v4031_v19, %s3617_s25 }
 0x6db   : > { %1310 = vrot.lane.b32.xlu0 %v4035_v24, %s3617_s25  ;;  %v1262_v24 = vld [vmem:[#allocation8 + $0x8] sm:$0xf] }
 0x6dc   : > { %v1267_v61 = vsel %vm896_vm3, %v1262_v24, 0 }
 0x6dd   : > { %2930 = vmatpush3.bf16.msra.mxu1 %v1267_v61 }
 0x6de   : > { %2941 = vmatprep.subr.bf16.mxu1 %v3613_v0 }
 0x74e   : > { %v1208_v55 = vpop.xlane.xlu0 %1207 }
 0x74f   : > { %3236 = vrcp.f32 %v1208_v55  ;;  %v3214_v55 = vld [vmem:[#allocation11] sm:$0xff]  }
 0x752   : > { %v1313_v58 = vpop.permute.xlu0 %1312 }
 0x753   : > { %v1318_v60 = vsel %vm834_vm2, %v1313_v58, 0 }
 0x756   : > { %v1311_v19 = vpop.permute.xlu0 %1310 }
 0x759   : > { %v3237_v56 = vpop.eup %3236 }
 0x75a   : > { %v1210_v57 = vmul.f32 %v3237_v56, %v3235_v52  ;;  %v3215_v56 = vld [vmem:[#allocation11 + $0x8] sm:$0xff]  }
 0x75c   : > { %v1211_v59 = vpack.c.bf16 %v1210_v57, %v1210_v57  ;;  %v1501_v57 = vld [vmem:[%s640_s26 + $0x8] sm:$0xff] }
 0x75e   : > { %2926 = vmatmul.mubr.msk.bf16.vlgmr.msra.gmra.mrb[20].mxu0 %vm834_vm2, %v1211_v59  ;;  %v3216_v59 = vld [vmem:[#allocation10] sm:$0xff]  }
 0x75f   : > { %2936 = vmatpush3.bf16.xpose.msra.mxu0 %v1318_v60  ;;  %2937 = vmatprep.mubr.msk.bf16.mxu0 %vm3614_vm0, %v3613_v0  ;;  %v3217_v60 = vld [vmem:[#allocation10 + $0x8] sm:$0xff]  }
 0x760   : > { %2947 = vmatprep.subr.bf16.mxu0 %v3613_v0 }
 0x766   : > { %2938 = vmatmul.mubr.msk.bf16.vlgmr.msra.gmra.mrb[24].mxu0 %vm834_vm2, %v1311_v19 }
 0x767   : > { %2949 = vmatprep.mubr.msk.bf16.mxu0 %vm3614_vm0, %v3613_v0  ;;  %2948 = vmatpush3.bf16.msra.mxu0 %v1427_v21  ;;  %v1510_v21 = vsub.s32 4, %v4019_v8 }
 0x768   : > { %2961 = vmatprep.subr.bf16.mxu0 %v3613_v0 }
 0x831   : > { %v1254_v62 = vpop.f32.mrb[20].mxu0 }
 0x832   : > { %v1260_v63 = vpack.c.bf16 %v1254_v62, %v1254_v62  ;;  %v2927_v1 = vpop.f32.mrb[21].mxu0  ;;  %v4159_v62 = vld [vmem:[%s4396_s14] sm:$0x3f] }
 0x833   : > { %v1257_v2 = vpop.f32.mrb[22].mxu0 }
 0x834   : > { %v2928_v3 = vpop.f32.mrb[23].mxu0  ;;  %2932 = vmatmul.mubr.msk.bf16.vlgmr.msra.gmra.mrb[20].mxu1 %vm834_vm2, %v1260_v63  ;;  %v1493_v63 = vrot.slane %v4159_v62, %v653_v11  ;;  %v1498_v2 = vrot.slane %v4159_v62, %v717_v9 }
 0x835   : > { %2943 = vmatprep.mubr.msk.bf16.mxu1 %vm3614_vm0, %v3613_v0 }
 0x839   : > { %v1354_v5 = vpop.f32.mrb[24].mxu0 }
 0x83a   : > { %v2939_v6 = vpop.f32.mrb[25].mxu0  ;;  %v1360_v7 = vsel %vm834_vm2, %v1354_v5, -inf }
 0x83b   : > { %1361 = vmax.xlane.f32.xlu0 %v1360_v7  ;;  %v1357_v12 = vpop.f32.mrb[26].mxu0 }
 0x83c   : > { %v2940_v13 = vpop.f32.mrb[27].mxu0  ;;  %v1573_v12 = vsub.s32 5, %v4019_v8 }
 0x83e   : > { %v1574_v11 = vrot.slane %v4022_v10, %v1573_v12 }
 0x8c8   : > { %v1362_v14 = vpop.xlane.xlu0 %1361 }
 0x8c9   : > { %v1363_v15 = vsub.f32 %v1354_v5, %v1362_v14 }
 0x8cb   : > { %v1364_v16 = vmul.f32 1.442695, %v1363_v15 }
 0x8cd   : > { %3238 = vpow2.f32 %v1364_v16 }
 0x8d7   : > { %v3239_v17 = vpop.eup %3238 }
 0x8d8   : > { %v1366_v18 = vsel %vm834_vm2, %v3239_v17, 0.0 }
 0x8d9   : > { %1367 = vadd.xlane.f32.xlu1 %v1366_v18 }
 0x8ea   : > { %1372 = vrot.lane.b32.xlu1 %v4063_v54, %s3617_s25 }
 0x907   : > { %v1303_v22 = vpop.f32.mrb[20].mxu1 }
 0x908   : > { %v1309_v23 = vadd.f32 %v1303_v22, %v4102_v39  ;;  %v2933_v25 = vpop.f32.mrb[21].mxu1  ;;  %v1473_v39 = vrot.slane %v4022_v10, %v1472_v38  ;;  %v1511_v22 = vrot.slane %v4022_v10, %v1510_v21 }
 0x909   : > { %v1306_v26 = vpop.f32.mrb[22].mxu1 }
 0x90a   : > { %v2934_v27 = vpop.f32.mrb[23].mxu1 }
 0x966   : > { %v1368_v28 = vpop.xlane.xlu1 %1367 }
 0x967   : > { %3240 = vrcp.f32 %v1368_v28 }
 0x96a   : > { %v1373_v29 = vpop.permute.xlu1 %1372 }
 0x96b   : > { %v1378_v30 = vsel %vm896_vm3, %v1373_v29, 0 }
 0x96c   : > { %2942 = vmatpush3.bf16.msra.mxu1 %v1378_v30 }
 0x96d   : > { %2953 = vmatprep.subr.bf16.mxu1 %v3613_v0 }
 0x971   : > { %v3241_v54 = vpop.eup %3240 }
 0x972   : > { %v1370_v31 = vmul.f32 %v3241_v54, %v3239_v17 }
 0x974   : > { %v1371_v32 = vpack.c.bf16 %v1370_v31, %v1370_v31  ;;  %v3218_v31 = vld [vmem:[#allocation13] sm:$0xff]  }
 0x976   : > { %2944 = vmatmul.mubr.msk.bf16.vlgmr.msra.gmra.mrb[24].mxu1 %vm834_vm2, %v1371_v32  ;;  %v3219_v32 = vld [vmem:[#allocation13 + $0x8] sm:$0xff]  }
 0x977   : > { %2957 = vmatprep.mubr.msk.bf16.mxu1 %vm3614_vm0, %v3613_v0  ;;  %2954 = vmatpush3.bf16.msra.mxu1 %v3216_v59 }
 0x978   : > { %2955 = vmatprep.subr.bf16.mxu1 %v3613_v0 }
 0x97b   : > { %2956 = vmatpush3.bf16.msra.mxu1 %v3217_v60 }
 0x97c   : > { %2969 = vmatprep.subr.bf16.mxu1 %v3613_v0 }
 0xa49   : > { %v1414_v33 = vpop.f32.mrb[24].mxu1 }
 0xa4a   : > { %v1420_v34 = vpack.c.bf16 %v1414_v33, %v1414_v33  ;;  %v2945_v35 = vpop.f32.mrb[25].mxu1 }
 0xa4b   : > { %v1417_v36 = vpop.f32.mrb[26].mxu1 }
 0xa4c   : > { %v2946_v37 = vpop.f32.mrb[27].mxu1  ;;  %2950 = vmatmul.mubr.msk.bf16.vlgmr.msra.gmra.mrb[28].mxu0 %vm834_vm2, %v1420_v34 }
 0xa4d   : > { %2965 = vmatprep.mubr.msk.bf16.mxu0 %vm3614_vm0, %v3613_v0  ;;  %2962 = vmatpush3.bf16.msra.mxu0 %v3214_v55 }
 0xa4e   : > { %2963 = vmatprep.subr.bf16.mxu0 %v3613_v0 }
 0xa51   : > { %2964 = vmatpush3.bf16.msra.mxu0 %v3215_v56 }
 0xa52   : > { %2977 = vmatprep.subr.bf16.mxu0 %v3613_v0 }
 0xb1f   : > { %v1463_v40 = vpop.f32.mrb[28].mxu0 }
 0xb20   : > { %v1469_v41 = vadd.f32 %v1463_v40, %v1309_v23  ;;  %v2951_v42 = vpop.f32.mrb[29].mxu0 }
 0xb21   : > { %v1466_v43 = vpop.f32.mrb[30].mxu0 }
 0xb22   : > { %v1474_v44 = vadd.f32 %v1473_v39, %v1469_v41  ;;  %v2952_v45 = vpop.f32.mrb[31].mxu0 }
 0xb24   : > { %v1475_v46 = vadd.f32 %v1474_v44, %v4006_v4  ;;  %v1500_v4 = vld [vmem:[%s640_s26] sm:$0xff]  ;;  %s3516_s26 = scalar_lea.vmem %s4341_s29, 128 }
 0xb25   : > { %v1502_v58 = vpack.c.bf16 %v1501_v57, %v1500_v4  ;;  %p3517_p6 = scmp.ne.s32.totalorder %s4341_s29, %s3516_s26  ;;  %p3524_p2 = scmp.lt.s32.totalorder %s3522_s11, %s3516_s26 }
 0xb26   : > { %v1476_v47 = vsel %vm667_vm1, %v1475_v46, 0.0 }
 0xb27   : > { %1477 = vadd.xlane.f32.xlu1 %v1476_v47  ;;  %2966 = vmatmul.mubr.msk.bf16.vlgmr.msra.gmra.mrb[32].mxu0 %vm667_vm1, %v1502_v58  ;;  %p3518_p5 = pnand %p3517_p6, %p4446_p9  ;;  %p3525_p3 = por %p3524_p2, %p3523_p0 }
 0xb28   : > { %2979 = vmatprep.mubr.msk.bf16.mxu0 %vm3614_vm0, %v3613_v0 }
 0xb29   : > { %p3519_p10 = pneg %p3518_p5 }
 0xb2b   : > { %p3526_p4 = pnand %p3525_p3, %p3519_p10 }
 0xbb4   : > { %v1478_v48 = vpop.xlane.xlu1 %1477 }
 0xbb5   : > { %v1480_v49 = vmul.f32 0.03125, %v1478_v48  ;;  %v1637_v48 = vsub.s32 6, %v4019_v8 }
 0xbb7   : > { %v1481_v50 = vsub.f32 %v1475_v46, %v1480_v49 }
 0xbb9   : > { %v1482_v52 = vmul.f32 %v1481_v50, %v1481_v50 }
 0xbbb   : > { %v1483_v53 = vsel %vm667_vm1, %v1482_v52, 0.0  ;;  %v1638_v52 = vrot.slane %v4022_v10, %v1637_v48 }
 0xbbc   : > { %1484 = vadd.xlane.f32.xlu0 %v1483_v53 }
 0xbfa   : > { %v1624_v13 = vpop.f32.mrb[32].mxu0 }
 0xbfb   : > { %v1625_v9 = vadd.f32 %v1624_v13, %v1574_v11  ;;  %v2967_v14 = vpop.f32.mrb[33].mxu0 }
 0xbfc   : > { %v1627_v15 = vpop.f32.mrb[34].mxu0 }
 0xbfd   : > { %v1628_v16 = vadd.f32 %v1627_v15, %v1574_v11  ;;  %v2968_v17 = vpop.f32.mrb[35].mxu0  ;;  %v1798_v15 = vld [vmem:[%s4391_s9] sm:$0xf] }
 0xbff   : > { %v4178_v18 = vpack.c.bf16 %v1628_v16, %v1625_v9 }
 0xc01   : > { %1803 = vrot.lane.b32.xlu0 %v4178_v18, %s3615_s20  ;;  %v1699_v20 = vsel %vm834_vm2, %v4178_v18, 0 }
 0xc02   : > { %2978 = vmatpush3.bf16.xpose.msra.mxu0 %v1699_v20  ;;  %v1963_v20 = vsel %vm896_vm3, %v1798_v15, 0 }
 0xc03   : > { %2989 = vmatprep.subr.bf16.mxu0 %v3613_v0 }
 0xc49   : > { %v1485_v19 = vpop.xlane.xlu0 %1484 }
 0xc4a   : > { %v1486_v24 = vmul.f32 0.03125, %v1485_v19 }
 0xc4c   : > { %v1487_v61 = vadd.f32 1e-05, %v1486_v24 }
 0xc4e   : > { %3242 = vrsqrt.f32 %v1487_v61 }
 0xc58   : > { %v3243_v1 = vpop.eup %3242 }
 0xc59   : > { %v1489_v3 = vmul.f32 %v3243_v1, %v1481_v50 }
 0xc5b   : > { %v1494_v5 = vmul.f32 %v1493_v63, %v1489_v3 }
 0xc5d   : > { %v4167_v6 = vadd.f32 %v1498_v2, %v1494_v5 }
 0xc5f   : > { %v1503_v7 = vpack.c.bf16 %v4167_v6, %v4167_v6 }
 0xc61   : > { %2958 = vmatmul.mubr.msk.bf16.vlgmr.msra.gmra.mrb[28].mxu1 %vm667_vm1, %v1503_v7  ;;  %v2757_v7 = vld [vmem:[%s4391_s9 + $0x4] sm:$0xf] }
 0xc62   : > { %2973 = vmatprep.mubr.msk.bf16.mxu1 %vm3614_vm0, %v3613_v0  ;;  %2970 = vmatpush3.bf16.msra.mxu1 %v3218_v31  ;;  %v1917_v11 = vsel %vm896_vm3, %v2757_v7, 0 }
 0xc63   : > { %2971 = vmatprep.subr.bf16.mxu1 %v3613_v0 }
 0xc66   : > { %2972 = vmatpush3.bf16.msra.mxu1 %v3219_v32 }
 0xc67   : > { %2983 = vmatprep.subr.bf16.mxu1 %v3613_v0 }
 0xc69   : > { %2974 = vmatmul.mubr.msk.bf16.vlgmr.msra.gmra.mrb[32].mxu1 %vm667_vm1, %v1502_v58 }
 0xc6a   : > { %2985 = vmatprep.mubr.msk.bf16.mxu1 %vm3614_vm0, %v3613_v0 }
 0xc73   : > { %v1804_v25 = vpop.permute.xlu0 %1803 }
 0xc74   : > { %v1809_v54 = vsel %vm834_vm2, %v1804_v25, 0 }
 0xd34   : > { %v1561_v23 = vpop.f32.mrb[28].mxu1 }
 0xd35   : > { %v1562_v26 = vadd.f32 %v1561_v23, %v1511_v22  ;;  %v2959_v27 = vpop.f32.mrb[29].mxu1 }
 0xd36   : > { %v1564_v28 = vpop.f32.mrb[30].mxu1 }
 0xd37   : > { %v4189_v29 = vpack.c.bf16 %v1562_v26, %v1562_v26  ;;  %v2960_v30 = vpop.f32.mrb[31].mxu1 }
 0xd39   : > { %1800 = vrot.lane.b32.xlu0 %v4189_v29, %s3615_s20  ;;  %2980 = vmatmul.mubr.msk.bf16.vlgmr.msra.gmra.mrb[36].mxu0 %vm834_vm2, %v4189_v29 }
 0xd3a   : > { %2990 = vmatpush3.bf16.xpose.msra.mxu0 %v1809_v54  ;;  %2991 = vmatprep.mubr.msk.bf16.mxu0 %vm3614_vm0, %v3613_v0 }
 0xd3b   : > { %3001 = vmatprep.subr.bf16.mxu0 %v3613_v0 }
 0xd3c   : > { %v1685_v49 = vpop.f32.mrb[32].mxu1 }
 0xd3d   : > { %v2975_v50 = vpop.f32.mrb[33].mxu1  ;;  %v1686_v56 = vadd.f32 %v1685_v49, %v1638_v52 }
 0xd3e   : > { %v1688_v53 = vpop.f32.mrb[34].mxu1 }
 0xd3f   : > { %v2976_v55 = vpop.f32.mrb[35].mxu1  ;;  %v1689_v4 = vadd.f32 %v1688_v53, %v1638_v52 }
 0xd41   : > { %v4211_v57 = vpack.c.bf16 %v1689_v4, %v1686_v56 }
 0xd43   : > { %2984 = vmatpush3.bf16.msra.mxu1 %v4211_v57 }
 0xd44   : > { %2995 = vmatprep.subr.bf16.mxu1 %v3613_v0 }
 0xdab   : > { %v1801_v33 = vpop.permute.xlu0 %1800 }
 0xdac   : > { %2992 = vmatmul.mubr.msk.bf16.vlgmr.msra.gmra.mrb[40].mxu0 %vm834_vm2, %v1801_v33 }
 0xdad   : > { %3003 = vmatprep.mubr.msk.bf16.mxu0 %vm3614_vm0, %v3613_v0  ;;  %3002 = vmatpush3.bf16.msra.mxu0 %v1917_v11 }
 0xdae   : > { %3013 = vmatprep.subr.bf16.mxu0 %v3613_v0 }
 0xe0c   : > { %v1735_v34 = vpop.f32.mrb[36].mxu0 }
 0xe0d   : > { %v2981_v35 = vpop.f32.mrb[37].mxu0  ;;  %v1742_v36 = vsel %vm1741_vm4, %v1735_v34, -inf }
 0xe0e   : > { %1743 = vmax.xlane.f32.xlu1 %v1742_v36  ;;  %v1738_v37 = vpop.f32.mrb[38].mxu0 }
 0xe0f   : > { %v2982_v39 = vpop.f32.mrb[39].mxu0 }
 0xe7f   : > { %v1845_v40 = vpop.f32.mrb[40].mxu0 }
 0xe80   : > { %v2993_v41 = vpop.f32.mrb[41].mxu0  ;;  %v1851_v42 = vsel %vm1741_vm4, %v1845_v40, -inf }
 0xe81   : > { %1852 = vmax.xlane.f32.xlu0 %v1851_v42  ;;  %v1848_v43 = vpop.f32.mrb[42].mxu0 }
 0xe82   : > { %v2994_v44 = vpop.f32.mrb[43].mxu0 }
 0xe9b   : > { %v1744_v45 = vpop.xlane.xlu1 %1743 }
 0xe9c   : > { %v1745_v46 = vsub.f32 %v1735_v34, %v1744_v45 }
 0xe9e   : > { %v1746_v47 = vmul.f32 1.442695, %v1745_v46 }
 0xea0   : > { %3244 = vpow2.f32 %v1746_v47 }
 0xeaa   : > { %v3245_v58 = vpop.eup %3244 }
 0xeab   : > { %v1748_v59 = vsel %vm1741_vm4, %v3245_v58, 0.0 }
 0xeac   : > { %1749 = vadd.xlane.f32.xlu1 %v1748_v59 }
 0xf0e   : > { %v1853_v60 = vpop.xlane.xlu0 %1852 }
 0xf0f   : > { %v1854_v19 = vsub.f32 %v1845_v40, %v1853_v60 }
 0xf11   : > { %v1855_v24 = vmul.f32 1.442695, %v1854_v19 }
 0xf13   : > { %3246 = vpow2.f32 %v1855_v24 }
 0xf1d   : > { %v3247_v61 = vpop.eup %3246 }
 0xf1e   : > { %v1857_v63 = vsel %vm1741_vm4, %v3247_v61, 0.0 }
 0xf1f   : > { %1858 = vadd.xlane.f32.xlu1 %v1857_v63  ;;  %v2762_v63 = vld [vmem:[%s4391_s9 + $0x8] sm:$0xf] }
 0xf30   : > { %1864 = vrot.lane.b32.xlu1 %v4211_v57, %s3615_s20 }
 0xf34   : > { %2007 = vrot.lane.b32.xlu1 %v4178_v18, %s3616_s13 }
 0xf38   : > { %2005 = vrot.lane.b32.xlu1 %v4189_v29, %s3616_s13 }
 0xf39   : > { %v1750_v1 = vpop.xlane.xlu1 %1749 }
 0xf3a   : > { %3248 = vrcp.f32 %v1750_v1  ;;  %v2120_v1 = vsel %vm896_vm3, %v2762_v63, 0 }
 0xf44   : > { %v3249_v2 = vpop.eup %3248 }
 0xf45   : > { %v1752_v3 = vmul.f32 %v3249_v2, %v3245_v58 }
 0xf47   : > { %v1753_v5 = vpack.c.bf16 %v1752_v3, %v1752_v3 }
 0xf49   : > { %2986 = vmatmul.mubr.msk.bf16.vlgmr.msra.gmra.mrb[36].mxu1 %vm1741_vm4, %v1753_v5 }
 0xf4a   : > { %2997 = vmatprep.mubr.msk.bf16.mxu1 %vm3614_vm0, %v3613_v0 }
 0xfac   : > { %v1859_v13 = vpop.xlane.xlu1 %1858 }
 0xfad   : > { %3250 = vrcp.f32 %v1859_v13 }
 0xfb0   : > { %v1865_v9 = vpop.permute.xlu1 %1864 }
 0xfb1   : > { %2996 = vmatpush3.bf16.msra.mxu1 %v1865_v9 }
 0xfb2   : > { %3007 = vmatprep.subr.bf16.mxu1 %v3613_v0 }
 0xfb4   : > { %v2008_v28 = vpop.permute.xlu1 %2007 }
 0xfb5   : > { %v2013_v33 = vsel %vm834_vm2, %v2008_v28, 0 }
 0xfb7   : > { %v3251_v14 = vpop.eup %3250 }
 0xfb8   : > { %v1861_v16 = vmul.f32 %v3251_v14, %v3247_v61  ;;  %v2006_v35 = vpop.permute.xlu1 %2005 }
 0xfba   : > { %v1862_v17 = vpack.c.bf16 %v1861_v16, %v1861_v16 }
 0xfbc   : > { %2998 = vmatmul.mubr.msk.bf16.vlgmr.msra.gmra.mrb[40].mxu1 %vm1741_vm4, %v1862_v17 }
 0xfbd   : > { %3008 = vmatpush3.bf16.msra.mxu1 %v1963_v20  ;;  %3009 = vmatprep.mubr.msk.bf16.mxu1 %vm3614_vm0, %v3613_v0 }
 0xfbe   : > { %3019 = vmatprep.subr.bf16.mxu1 %v3613_v0 }
0x101c   : > { %v1791_v22 = vpop.f32.mrb[36].mxu1 }
0x101d   : > { %v1797_v23 = vpack.c.bf16 %v1791_v22, %v1791_v22  ;;  %v2987_v25 = vpop.f32.mrb[37].mxu1 }
0x101e   : > { %v1794_v26 = vpop.f32.mrb[38].mxu1 }
0x101f   : > { %v2988_v27 = vpop.f32.mrb[39].mxu1  ;;  %3010 = vmatmul.mubr.msk.bf16.vlgmr.msra.gmra.mrb[44].mxu1 %vm834_vm2, %v1797_v23  ;;  %v2766_v26 = vld [vmem:[%s4391_s9 + $0xc] sm:$0xf] }
0x1020   : > { %3021 = vmatprep.mubr.msk.bf16.mxu1 %vm3614_vm0, %v3613_v0  ;;  %v2278_v27 = vsel %vm896_vm3, %v2766_v26, 0 }
0x108f   : > { %v1904_v30 = vpop.f32.mrb[40].mxu1 }
0x1090   : > { %v1910_v54 = vpack.c.bf16 %v1904_v30, %v1904_v30  ;;  %v2999_v31 = vpop.f32.mrb[41].mxu1 }
0x1091   : > { %v1907_v32 = vpop.f32.mrb[42].mxu1 }
0x1092   : > { %v3000_v34 = vpop.f32.mrb[43].mxu1  ;;  %3004 = vmatmul.mubr.msk.bf16.vlgmr.msra.gmra.mrb[44].mxu0 %vm834_vm2, %v1910_v54 }
0x1093   : > { %3014 = vmatpush3.bf16.xpose.msra.mxu0 %v2013_v33  ;;  %3015 = vmatprep.mubr.msk.bf16.mxu0 %vm3614_vm0, %v3613_v0 }
0x1094   : > { %3025 = vmatprep.subr.bf16.mxu0 %v3613_v0 }
0x109a   : > { %3016 = vmatmul.mubr.msk.bf16.vlgmr.msra.gmra.mrb[48].mxu0 %vm834_vm2, %v2006_v35 }
0x109b   : > { %3027 = vmatprep.mubr.msk.bf16.mxu0 %vm3614_vm0, %v3613_v0  ;;  %3026 = vmatpush3.bf16.msra.mxu0 %v2120_v1  ;;  %v2348_v1 = vrot.slane %v4159_v62, %v1472_v38  ;;  %v2768_v38 = vld [vmem:[%s4442_s18] ss:$0 sm:$0xff] }
0x109c   : > { %3037 = vmatprep.subr.bf16.mxu0 %v3613_v0 }
0x10f2   : > { %v1999_v36 = vpop.f32.mrb[44].mxu1 }
0x10f3   : > { %v3011_v37 = vpop.f32.mrb[45].mxu1 }
0x10f4   : > { %v2002_v39 = vpop.f32.mrb[46].mxu1 }
0x10f5   : > { %v3012_v40 = vpop.f32.mrb[47].mxu1 }
0x1165   : > { %v1953_v41 = vpop.f32.mrb[44].mxu0 }
0x1166   : > { %v4251_v42 = vadd.f32 %v1999_v36, %v1953_v41  ;;  %v3005_v43 = vpop.f32.mrb[45].mxu0 }
0x1167   : > { %v1956_v44 = vpop.f32.mrb[46].mxu0  ;;  %v2323_v43 = vsub.s32 7, %v4019_v8 }
0x1168   : > { %v3006_v45 = vpop.f32.mrb[47].mxu0 }
0x1169   : > { %v2324_v44 = vrot.slane %v4022_v10, %v2323_v43  ;;  %v3221_v10 = vld [vmem:[#allocation14 + $0x8] sm:$0xff]  }
0x116d   : > { %v2049_v46 = vpop.f32.mrb[48].mxu0 }
0x116e   : > { %v3017_v47 = vpop.f32.mrb[49].mxu0  ;;  %v2055_v48 = vsel %vm1741_vm4, %v2049_v46, -inf }
0x116f   : > { %2056 = vmax.xlane.f32.xlu0 %v2055_v48  ;;  %v2052_v49 = vpop.f32.mrb[50].mxu0 }
0x1170   : > { %v3018_v50 = vpop.f32.mrb[51].mxu0 }
0x1185   : > { %2067 = vrot.lane.b32.xlu0 %v4211_v57, %s3616_s13  ;;  %s4441_s13 = sld [smem:[#allocation33_spill]] }
0x1189   : > { %2165 = vrot.lane.b32.xlu0 %v4178_v18, %s3617_s25 }
0x118d   : > { %2163 = vrot.lane.b32.xlu0 %v4189_v29, %s3617_s25 }
0x11fc   : > { %v2057_v52 = vpop.xlane.xlu0 %2056 }
0x11fd   : > { %v2058_v53 = vsub.f32 %v2049_v46, %v2057_v52 }
0x11ff   : > { %v2059_v55 = vmul.f32 1.442695, %v2058_v53 }
0x1200   : > { %v2068_v56 = vpop.permute.xlu0 %2067 }
0x1201   : > { %3252 = vpow2.f32 %v2059_v55  ;;  %3020 = vmatpush3.bf16.msra.mxu1 %v2068_v56 }
0x1202   : > { %3031 = vmatprep.subr.bf16.mxu1 %v3613_v0 }
0x1204   : > { %v2166_v18 = vpop.permute.xlu0 %2165 }
0x1205   : > { %v2171_v29 = vsel %vm834_vm2, %v2166_v18, 0 }
0x1208   : > { %v2164_v61 = vpop.permute.xlu0 %2163 }
0x120b   : > { %v3253_v4 = vpop.eup %3252 }
0x120c   : > { %v2061_v58 = vsel %vm1741_vm4, %v3253_v4, 0.0 }
0x120d   : > { %2062 = vadd.xlane.f32.xlu1 %v2061_v58 }
0x129a   : > { %v2063_v59 = vpop.xlane.xlu1 %2062 }
0x129b   : > { %3254 = vrcp.f32 %v2063_v59 }
0x12a5   : > { %v3255_v60 = vpop.eup %3254 }
0x12a6   : > { %v2065_v19 = vmul.f32 %v3255_v60, %v3253_v4  ;;  %v3220_v60 = vld [vmem:[#allocation14] sm:$0xff]  }
0x12a8   : > { %v2066_v24 = vpack.c.bf16 %v2065_v19, %v2065_v19  ;;  %v3223_v19 = vld [vmem:[%s4441_s13 + $0x8] sm:$0xff]  }
0x12aa   : > { %3022 = vmatmul.mubr.msk.bf16.vlgmr.msra.gmra.mrb[48].mxu1 %vm1741_vm4, %v2066_v24 }
0x12ab   : > { %3032 = vmatpush3.bf16.xpose.msra.mxu1 %v2171_v29  ;;  %3033 = vmatprep.mubr.msk.bf16.mxu1 %vm3614_vm0, %v3613_v0 }
0x12ac   : > { %3043 = vmatprep.subr.bf16.mxu1 %v3613_v0 }
0x12b2   : > { %3034 = vmatmul.mubr.msk.bf16.vlgmr.msra.gmra.mrb[52].mxu1 %vm834_vm2, %v2164_v61  ;;  %v2343_v61 = vrot.slane %v4159_v62, %v777_v51  ;;  %v3225_v51 = vld [vmem:[%s4441_s13 + $0x18] sm:$0xff]  }
0x12b3   : > { %3045 = vmatprep.mubr.msk.bf16.mxu1 %vm3614_vm0, %v3613_v0  ;;  %3044 = vmatpush3.bf16.msra.mxu1 %v2278_v27 }
0x12b4   : > { %3057 = vmatprep.subr.bf16.mxu1 %v3613_v0 }
0x137d   : > { %v2107_v2 = vpop.f32.mrb[48].mxu1 }
0x137e   : > { %v2113_v3 = vpack.c.bf16 %v2107_v2, %v2107_v2  ;;  %v3023_v5 = vpop.f32.mrb[49].mxu1 }
0x137f   : > { %v2110_v7 = vpop.f32.mrb[50].mxu1 }
0x1380   : > { %v3024_v11 = vpop.f32.mrb[51].mxu1  ;;  %3028 = vmatmul.mubr.msk.bf16.vlgmr.msra.gmra.mrb[52].mxu0 %vm834_vm2, %v2113_v3 }
0x1381   : > { %3039 = vmatprep.mubr.msk.bf16.mxu0 %vm3614_vm0, %v3613_v0  ;;  %v3224_v11 = vld [vmem:[%s4441_s13 + $0x10] sm:$0xff]  }
0x1385   : > { %v2207_v13 = vpop.f32.mrb[52].mxu1 }
0x1386   : > { %v3035_v9 = vpop.f32.mrb[53].mxu1  ;;  %v2213_v14 = vsel %vm1741_vm4, %v2207_v13, -inf }
0x1387   : > { %2214 = vmax.xlane.f32.xlu0 %v2213_v14  ;;  %v2210_v15 = vpop.f32.mrb[54].mxu1 }
0x1388   : > { %v3036_v16 = vpop.f32.mrb[55].mxu1 }
0x1414   : > { %v2215_v17 = vpop.xlane.xlu0 %2214 }
0x1415   : > { %v2216_v20 = vsub.f32 %v2207_v13, %v2215_v17 }
0x1417   : > { %v2217_v22 = vmul.f32 1.442695, %v2216_v20 }
0x1419   : > { %3256 = vpow2.f32 %v2217_v22  ;;  %v2772_v22 = vld [vmem:[#allocation16 + $0x8] ss:$0 sm:$0xff] }
0x1423   : > { %v3257_v23 = vpop.eup %3256 }
0x1424   : > { %v2219_v25 = vsel %vm1741_vm4, %v3257_v23, 0.0 }
0x1425   : > { %2220 = vadd.xlane.f32.xlu1 %v2219_v25 }
0x1436   : > { %2225 = vrot.lane.b32.xlu1 %v4211_v57, %s3617_s25 }
0x1453   : > { %v2156_v28 = vpop.f32.mrb[52].mxu0 }
0x1454   : > { %v2162_v30 = vadd.f32 %v2156_v28, %v4251_v42  ;;  %v3029_v54 = vpop.f32.mrb[53].mxu0 }
0x1455   : > { %v2159_v31 = vpop.f32.mrb[54].mxu0 }
0x1456   : > { %v3030_v32 = vpop.f32.mrb[55].mxu0 }
0x14b2   : > { %v2221_v33 = vpop.xlane.xlu1 %2220 }
0x14b3   : > { %3258 = vrcp.f32 %v2221_v33 }
0x14b6   : > { %v2226_v34 = vpop.permute.xlu1 %2225 }
0x14b7   : > { %3038 = vmatpush3.bf16.msra.mxu0 %v2226_v34 }
0x14b8   : > { %3049 = vmatprep.subr.bf16.mxu0 %v3613_v0 }
0x14bd   : > { %v3259_v57 = vpop.eup %3258 }
0x14be   : > { %v2223_v35 = vmul.f32 %v3259_v57, %v3257_v23 }
0x14c0   : > { %v2224_v36 = vpack.c.bf16 %v2223_v35, %v2223_v35 }
0x14c2   : > { %3040 = vmatmul.mubr.msk.bf16.vlgmr.msra.gmra.mrb[56].mxu0 %vm1741_vm4, %v2224_v36 }
0x14c3   : > { %3053 = vmatprep.mubr.msk.bf16.mxu0 %vm3614_vm0, %v3613_v0  ;;  %3050 = vmatpush3.bf16.msra.mxu0 %v3220_v60 }
0x14c4   : > { %3051 = vmatprep.subr.bf16.mxu0 %v3613_v0 }
0x14c7   : > { %3052 = vmatpush3.bf16.msra.mxu0 %v3221_v10 }
0x1595   : > { %v2265_v37 = vpop.f32.mrb[56].mxu0 }
0x1596   : > { %v2271_v39 = vpack.c.bf16 %v2265_v37, %v2265_v37  ;;  %v3041_v40 = vpop.f32.mrb[57].mxu0  ;;  %v2516_v37 = vrot.slane %v4159_v62, %v1510_v21 }
0x1597   : > { %v2268_v41 = vpop.f32.mrb[58].mxu0  ;;  %v2521_v40 = vrot.slane %v4159_v62, %v1573_v12 }
0x1598   : > { %v3042_v42 = vpop.f32.mrb[59].mxu0  ;;  %3046 = vmatmul.mubr.msk.bf16.vlgmr.msra.gmra.mrb[56].mxu1 %vm834_vm2, %v2271_v39 }
0x1599   : > { %3065 = vmatprep.mubr.msk.bf16.mxu1 %vm3614_vm0, %v3613_v0 }
0x166b   : > { %v2314_v45 = vpop.f32.mrb[56].mxu1 }
0x166c   : > { %v2320_v46 = vadd.f32 %v2314_v45, %v2162_v30  ;;  %v3047_v47 = vpop.f32.mrb[57].mxu1 }
0x166d   : > { %v2317_v48 = vpop.f32.mrb[58].mxu1 }
0x166e   : > { %v2325_v49 = vadd.f32 %v2324_v44, %v2320_v46  ;;  %v3048_v50 = vpop.f32.mrb[59].mxu1 }
0x1670   : > { %v2326_v52 = vadd.f32 %v2325_v49, %v4167_v6  ;;  %v3222_v6 = vld [vmem:[%s4441_s13] sm:$0xff]  }
0x1671   : > { %3058 = vmatpush3.bf16.msra.mxu1 %v3222_v6 }
0x1672   : > { %v2327_v53 = vsel %vm667_vm1, %v2326_v52, 0.0  ;;  %3059 = vmatprep.subr.bf16.mxu1 %v3613_v0 }
0x1673   : > { %2328 = vadd.xlane.f32.xlu1 %v2327_v53 }
0x1675   : > { %3060 = vmatpush3.bf16.msra.mxu1 %v3223_v19 }
0x1676   : > { %3061 = vmatprep.subr.bf16.mxu1 %v3613_v0 }
0x1679   : > { %3062 = vmatpush3.bf16.msra.mxu1 %v3224_v11 }
0x167a   : > { %3063 = vmatprep.subr.bf16.mxu1 %v3613_v0 }
0x167d   : > { %3064 = vmatpush3.bf16.msra.mxu1 %v3225_v51 }
0x1700   : > { %v2329_v55 = vpop.xlane.xlu1 %2328 }
0x1701   : > { %v2330_v56 = vmul.f32 0.03125, %v2329_v55 }
0x1703   : > { %v2331_v4 = vsub.f32 %v2326_v52, %v2330_v56 }
0x1705   : > { %v2332_v58 = vmul.f32 %v2331_v4, %v2331_v4 }
0x1707   : > { %v2333_v59 = vsel %vm667_vm1, %v2332_v58, 0.0 }
0x1708   : > { %2334 = vadd.xlane.f32.xlu0 %v2333_v59 }
0x1795   : > { %v2335_v18 = vpop.xlane.xlu0 %2334 }
0x1796   : > { %v2336_v24 = vmul.f32 0.03125, %v2335_v18 }
0x1798   : > { %v2337_v29 = vadd.f32 1e-05, %v2336_v24 }
0x179a   : > { %3260 = vrsqrt.f32 %v2337_v29 }
0x17a4   : > { %v3261_v63 = vpop.eup %3260 }
0x17a5   : > { %v2339_v2 = vmul.f32 %v3261_v63, %v2331_v4 }
0x17a7   : > { %v2344_v3 = vmul.f32 %v2343_v61, %v2339_v2 }
0x17a9   : > { %v2349_v5 = vadd.f32 %v2348_v1, %v2344_v3 }
0x17ab   : > { %v2350_v7 = vpack.c.bf16 %v2349_v5, %v2349_v5 }
0x17ad   : > { %3054 = vmatmul.mubr.msk.bf16.vlgmr.msra.gmra.mrb[60].mxu0 %vm667_vm1, %v2350_v7 }
0x1880   : > { %v2411_v13 = vpop.f32.mrb[60].mxu0 }
0x1881   : > { %v2412_v9 = vadd.f32 %v2768_v38, %v2411_v13  ;;  %v3055_v14 = vpop.f32.mrb[61].mxu0 }
0x1882   : > { %v2414_v15 = vpop.f32.mrb[62].mxu0 }
0x1883   : > { %v2417_v16 = vmax.f32 %v2412_v9, 0.0  ;;  %v3056_v17 = vpop.f32.mrb[63].mxu0 }
0x1885   : > { %v2418_v20 = vpack.c.bf16 %v2417_v16, %v2417_v16 }
0x1887   : > { %3066 = vmatmul.mubr.msk.bf16.vlgmr.msra.gmra.mrb[60].mxu1 %vm2455_vm5, %v2418_v20 }
0x195a   : > { %v2493_v0 = vpop.f32.mrb[60].mxu1 }
0x195b   : > { %v2494_v23 = vadd.f32 %v2772_v22, %v2493_v0  ;;  %v3067_v25 = vpop.f32.mrb[61].mxu1 }
0x195c   : > { %v2496_v26 = vpop.f32.mrb[62].mxu1 }
0x195d   : > { %v3068_v27 = vpop.f32.mrb[63].mxu1  ;;  %v2499_v28 = vadd.f32 %v2494_v23, %v2349_v5 }
0x195f   : > { %v2500_v30 = vsel %vm667_vm1, %v2499_v28, 0.0 }
0x1960   : > { %2501 = vadd.xlane.f32.xlu0 %v2500_v30 }
0x19ed   : > { %v2502_v54 = vpop.xlane.xlu0 %2501 }
0x19ee   : > { %v2503_v31 = vmul.f32 0.03125, %v2502_v54 }
0x19f0   : > { %v2504_v32 = vsub.f32 %v2499_v28, %v2503_v31 }
0x19f2   : > { %v2505_v33 = vmul.f32 %v2504_v32, %v2504_v32 }
0x19f4   : > { %v2506_v34 = vsel %vm667_vm1, %v2505_v33, 0.0 }
0x19f5   : > { %2507 = vadd.xlane.f32.xlu0 %v2506_v34 }
0x1a82   : > { %v2508_v57 = vpop.xlane.xlu0 %2507 }
0x1a83   : > { %v2509_v35 = vmul.f32 0.03125, %v2508_v57 }
0x1a85   : > { %v2510_v36 = vadd.f32 1e-05, %v2509_v35 }
0x1a87   : > { %3262 = vrsqrt.f32 %v2510_v36 }
0x1a91   : > { %v3263_v39 = vpop.eup %3262 }
0x1a92   : > { %v2512_v41 = vmul.f32 %v3263_v39, %v2504_v32 }
0x1a94   : > { %v2517_v42 = vmul.f32 %v2516_v37, %v2512_v41 }
0x1a96   : > { %v2522_v43 = vadd.f32 %v2521_v40, %v2517_v42 }
0x1a98   : > { %2523 = vst.msk [vmem:[%s631_s16] sm:$0xff] %vm667_vm1, %v2522_v43 }
0x1a99   : > { %3529 = shalt.err (!%p3526_p4)
}
0x1a9a   : > { %s3530_s24 = scalar_lea.hbm %s4339_s21, 128  ;;  %s3534_s28 = scalar_lea.hbm %s4445_s27, 256 }
0x1a9b   : > { %p3531_p12 = scmp.ne.s32.totalorder %s4339_s21, %s3530_s24  ;;  %p3535_p11 = scmp.lt.u32.totalorder %s4339_s21, %s4445_s27 }
0x1a9c   : > { %p3536_p13 = scmp.lt.u32.totalorder %s3534_s28, %s3530_s24  ;;  %p3538_p6 = scmp.lt.u32.totalorder %s3530_s24, %s4339_s21 }
0x1a9d   : > { %p3532_p7 = pnand %p3531_p12, %p4446_p9 }
0x1a9e   : > { %p3537_p1 = por %p3536_p13, %p3535_p11 }
0x1a9f   : > { %p3533_p8 = pneg %p3532_p7 }
0x1aa0   : > { %p3539_p5 = por %p3538_p6, %p3537_p1 }
0x1aa2   : > { %p3540_p10 = pnand %p3539_p5, %p3533_p8 }
0x1aa4   : > { %3543 = shalt.err (!%p3540_p10)
}
0x1aa5   : > { %3105 = dma.vmem_to_hbm [thread:$0]  (%p4446_p9), %s4341_s29, 128, %s4339_s21, %s2525_s17  }
0x1aa6 PF: > { %s4447_s16 = sld [smem:[#allocation27_spill]]  ;;  %s4448_s20 = sld [smem:[#allocation24_spill]] }
0x1aa7   : > { %s4449_s25 = sld [smem:[#allocation31_spill]] }
0x1aac   : > { %p3157_p0 = scmp.ge.s32.totalorder %s4447_s16, 2  ;;  %s2550_s26 = sand.u32 1, %s4448_s20  }
0x1aad   : > { %p4450_p2 = scmp.ne.s32.totalorder %s4449_s25, 0  ;;  %s2551_s22 = scalar_lea.sflag [#allocation4], %s2550_s26 }
0x1aaf   : > { %p3136_p3 = pnand %p3157_p0, %p4450_p2 }
0x1ab1   : > { %3581 = dma.done.wait (!%p3136_p3), %s2551_s22, 128  }
0x1ab2   : > { %3583 = vsyncadd (!%p3136_p3), %s2551_s22, 4294967168  ;;  %s4451_s21 = sld [smem:[#allocation28_spill]]  ;;  %s4452_s18 = sld [smem:[#allocation25_spill]] }
0x1ab3   : > { %s4453_s19 = sld [smem:[#allocation26_spill]]  ;;  %s4454_s20 = sld [smem:[#allocation29_spill]] }
0x1ab8   : > { %p30_p4 = scmp.ge.s32.totalorder %s4451_s21, 4  }
0x1aba   :  { %32 = sbr.rel (!%p30_p4) target bundleno = 13 (0xd), region = 161 }
0x1ac1   :  { %2556 = vsyncpa [#allocation3], 1 }
0x1ac2   :  { %2558 = vsyncpa [#allocation3 + $0x1], 1 }
0x1ac3   :  { %2559 = vsyncpa [#allocation6], 1 }
0x1ac4   :  { %2560 = vsyncpa [#allocation9], 1 }
0x1ac5   :  { %2561 = vsyncpa [#allocation12], 1 }
0x1ac6   :  { %2562 = vsyncpa [#allocation15], 1 }
0x1ac7   :  { %2563 = vsyncpa [#allocation4], 1 }
0x1ac8   :  { %2565 = vsyncpa [#allocation4 + $0x1], 1 }

</bundles_post_ra>
